<compile_context>
chip_gen: v7x
topology: tpu7x:2x2x1
jax: 0.10.0
libtpu: 0.0.40
codegen_flags: <defaults>
</compile_context>

<pallas_src>
import numpy as np
import jax
import jax.numpy as jnp
from jax.experimental import pallas as pl
from jax.experimental.pallas import tpu as pltpu


def _make_bigru_call(T_pad, Tc, B, H):
    """pallas_call running both GRU directions; grid = (direction, time-chunk)."""
    nc = T_pad // Tc

    def kernel(lens_ref, gi_ref, wh_ref, bhn_ref, out_ref, ht_ref):
        d = pl.program_id(0)          # 0 = forward, 1 = backward
        c = pl.program_id(1)          # chunk step in processing order

        # Hidden state lives in the resident (B, H) final-hidden output block.
        @pl.when(c == 0)
        def _init():
            ht_ref[...] = jnp.zeros_like(ht_ref)

        wh_r = wh_ref[0]              # (H, H) = W_hh_r^T
        wh_z = wh_ref[1]
        wh_n = wh_ref[2]
        bh_n = bhn_ref[...]           # (1, H)   (b_hn cannot be folded: r*(hW+b))
        lens = lens_ref[...]          # (B, 1) int32

        # Natural-time chunk index (index_map fetched this same chunk).
        chunk_nat = d * (nc - 1) + (1 - 2 * d) * c
        t_base = chunk_nat * Tc

        def step(lt, h):
            # local natural-time index within the chunk (reversed when d == 1)
            li = d * (Tc - 1) + (1 - 2 * d) * lt
            t_abs = t_base + li
            gi_t = gi_ref[li]                                   # (3, B, H)
            gh_r = jnp.dot(h, wh_r, preferred_element_type=jnp.float32)
            gh_z = jnp.dot(h, wh_z, preferred_element_type=jnp.float32)
            gh_n = jnp.dot(h, wh_n, preferred_element_type=jnp.float32) + bh_n
            r = jax.nn.sigmoid(gi_t[0] + gh_r)
            z = jax.nn.sigmoid(gi_t[1] + gh_z)
            n = jnp.tanh(gi_t[2] + r * gh_n)
            h_new = (1.0 - z) * n + z * h
            mask = t_abs < lens                                 # (B, 1) bool
            out_ref[li] = jnp.where(mask, h_new, 0.0)           # zero past length
            return jnp.where(mask, h_new, h)                    # freeze past length

        ht_ref[...] = jax.lax.fori_loop(0, Tc, step, ht_ref[...], unroll=True)

    chunk4 = lambda d, c: (d, d * (nc - 1) + (1 - 2 * d) * c, 0, 0)
    chunk5 = lambda d, c: (d, d * (nc - 1) + (1 - 2 * d) * c, 0, 0, 0)

    return pl.pallas_call(
        kernel,
        out_shape=(jax.ShapeDtypeStruct((2, T_pad, B, H), jnp.float32),
                   jax.ShapeDtypeStruct((2, B, H), jnp.float32)),
        grid_spec=pltpu.PrefetchScalarGridSpec(
            num_scalar_prefetch=0,
            grid=(2, nc),
            in_specs=[
                pl.BlockSpec((B, 1), lambda d, c: (0, 0)),            # lengths (resident)
                pl.BlockSpec((None, Tc, 3, B, H), chunk5),            # precomputed gi
                pl.BlockSpec((None, 3, H, H), lambda d, c: (d, 0, 0, 0)),   # W_hh^T per gate
                pl.BlockSpec((None, 1, H), lambda d, c: (d, 0, 0)),         # b_hn
            ],
            out_specs=[
                pl.BlockSpec((None, Tc, B, H), chunk4),               # per-timestep output
                pl.BlockSpec((None, B, H), lambda d, c: (d, 0, 0)),   # final hidden (resident)
            ],
        ),
        compiler_params=pltpu.CompilerParams(
            dimension_semantics=("parallel", "arbitrary")),
    )


def dynamic_rnn_forward(x, x_len, params, time_chunk=32):
    """Equivalent of Dynamic_RNN.forward (GRU, 1 layer, bidirectional).

    x:      (B, T, input_size) float32, batch_first
    x_len:  numpy int array (B,), valid lengths
    returns (out, ht):
      out: (B, max(x_len), 2*H)  zeros past each sequence's length
      ht:  (2, B, H)             [forward final hidden; backward final hidden]
    """
    B, T, I = x.shape
    H = params["weight_hh_l0"].shape[1]
    Tc = min(int(time_chunk), T)
    T_pad = -(-T // Tc) * Tc

    lens = jnp.asarray(np.asarray(x_len), jnp.int32).reshape(B, 1)

    def prep(sfx):
        wi = jnp.transpose(params["weight_ih" + sfx])                 # (I, 3H)
        bi = params["bias_ih" + sfx]                                  # (3H,)
        bh = params["bias_hh" + sfx]                                  # (3H,)
        # Fold b_ih (all gates) + b_hh (r, z only) into the hoisted projection.
        b_fold = bi + jnp.concatenate([bh[:2 * H], jnp.zeros((H,), bh.dtype)])
        wh = params["weight_hh" + sfx]                                # (3H, H)
        wh_g = jnp.transpose(wh.reshape(3, H, H), (0, 2, 1))          # (3, H, H) = W_hh_g^T
        return wi, b_fold, wh_g, bh[2 * H:]

    wi_f, bf_f, whg_f, bhn_f = prep("_l0")
    wi_b, bf_b, whg_b, bhn_b = prep("_l0_reverse")

    # Hoisted input projection: one (B*T, I) @ (I, 6H) matmul for BOTH directions.
    Wi = jnp.concatenate([wi_f, wi_b], axis=1)                        # (I, 6H)
    b_all = jnp.concatenate([bf_f, bf_b])                             # (6H,)
    gi = x.reshape(B * T, I) @ Wi + b_all                             # (B*T, 6H)
    gi = gi.reshape(B, T, 2, 3, H).transpose(2, 1, 3, 0, 4)           # (2, T, 3, B, H)
    if T_pad != T:
        gi = jnp.pad(gi, ((0, 0), (0, T_pad - T), (0, 0), (0, 0), (0, 0)))

    wh_all = jnp.stack([whg_f, whg_b])                                # (2, 3, H, H)
    bhn_all = jnp.stack([bhn_f, bhn_b]).reshape(2, 1, H)              # (2, 1, H)

    call = _make_bigru_call(T_pad, Tc, B, H)
    out_dirs, ht = call(lens, gi, wh_all, bhn_all)                    # (2,T_pad,B,H), (2,B,H)

    t_max = int(np.max(np.asarray(x_len)))
    out = jnp.transpose(out_dirs, (2, 1, 0, 3)).reshape(B, T_pad, 2 * H)
    out = out[:, :t_max, :]                                           # pad_packed trims
    return out, ht


# ----------------------------- pure-JAX reference -----------------------------
def _ref_gru_dir(x_tm, lens, wi, wh, bi, bh, reverse, H):
    T, B, _ = x_tm.shape
    ts = jnp.arange(T)
    if reverse:
        ts = ts[::-1]

    def step(h, t):
        x_t = x_tm[t]
        gi = x_t @ wi + bi
        gh = h @ wh + bh
        r = jax.nn.sigmoid(gi[:, :H] + gh[:, :H])
        z = jax.nn.sigmoid(gi[:, H:2 * H] + gh[:, H:2 * H])
        n = jnp.tanh(gi[:, 2 * H:] + r * gh[:, 2 * H:])
        h_new = (1.0 - z) * n + z * h
        mask = t < lens
        return jnp.where(mask, h_new, h), (t, jnp.where(mask, h_new, 0.0))

    h0 = jnp.zeros((B, H), jnp.float32)
    hT, (tt, outs) = jax.lax.scan(step, h0, ts)
    out = jnp.zeros((T, B, H), jnp.float32).at[tt].set(outs)
    return out, hT


def _reference_forward(x, x_len, params):
    B, T, I = x.shape
    H = params["weight_hh_l0"].shape[1]
    x_tm = jnp.transpose(x, (1, 0, 2))
    lens = jnp.asarray(np.asarray(x_len), jnp.int32).reshape(B, 1)

    def run(reverse, suffix):
        wi = jnp.transpose(params["weight_ih" + suffix])
        wh = jnp.transpose(params["weight_hh" + suffix])
        bi = params["bias_ih" + suffix].reshape(1, 3 * H)
        bh = params["bias_hh" + suffix].reshape(1, 3 * H)
        return _ref_gru_dir(x_tm, lens, wi, wh, bi, bh, reverse, H)

    out_f, h_f = run(False, "_l0")
    out_b, h_b = run(True, "_l0_reverse")
    out = jnp.transpose(jnp.concatenate([out_f, out_b], axis=-1), (1, 0, 2))
    out = out[:, :int(np.max(np.asarray(x_len))), :]
    return out, jnp.stack([h_f, h_b], axis=0)


if __name__ == "__main__":
    B, T, I, H = 4, 8, 16, 32

    key = jax.random.PRNGKey(0)
    keys = iter(jax.random.split(key, 16))
    bound = 1.0 / np.sqrt(H)

    def u(kk, shape):
        return jax.random.uniform(kk, shape, jnp.float32, -bound, bound)

    # nn.GRU parameter shapes (bidirectional, 1 layer), deterministic init.
    params = {
        "weight_ih_l0":         u(next(keys), (3 * H, I)),
        "weight_hh_l0":         u(next(keys), (3 * H, H)),
        "bias_ih_l0":           u(next(keys), (3 * H,)),
        "bias_hh_l0":           u(next(keys), (3 * H,)),
        "weight_ih_l0_reverse": u(next(keys), (3 * H, I)),
        "weight_hh_l0_reverse": u(next(keys), (3 * H, H)),
        "bias_ih_l0_reverse":   u(next(keys), (3 * H,)),
        "bias_hh_l0_reverse":   u(next(keys), (3 * H,)),
    }

    x = jax.random.normal(next(keys), (B, T, I), jnp.float32)
    x_len = np.array([8, 5, 3, 1], dtype=np.int64)   # variable lengths, max == T

    out, ht = dynamic_rnn_forward(x, x_len, params)
    jax.block_until_ready((out, ht))

    out_ref, ht_ref = _reference_forward(x, x_len, params)
    assert out.shape == (B, int(x_len.max()), 2 * H)
    assert ht.shape == (2, B, H)
    np.testing.assert_allclose(np.asarray(out), np.asarray(out_ref), atol=1e-5, rtol=1e-5)
    np.testing.assert_allclose(np.asarray(ht), np.asarray(ht_ref), atol=1e-5, rtol=1e-5)

    print("KERNEL_OK")
</pallas_src>

<mosaic_0001>
module attributes {stable_mosaic.version = 11 : i64} {
  func.func @kernel(%arg0: i32, %arg1: i32, %arg2: memref<4x1xi32, #tpu.memory_space<vmem>>, %arg3: memref<1x8x3x4x32xf32, #tpu.memory_space<vmem>>, %arg4: memref<1x3x32x32xf32, #tpu.memory_space<vmem>>, %arg5: memref<1x1x32xf32, #tpu.memory_space<vmem>>, %arg6: memref<1x8x4x32xf32, #tpu.memory_space<vmem>>, %arg7: memref<1x4x32xf32, #tpu.memory_space<vmem>>) attributes {dimension_semantics = [#tpu.dimension_semantics<parallel>, #tpu.dimension_semantics<arbitrary>], iteration_bounds = array<i64: 2, 1>, scalar_prefetch = 0 : i64, scratch_operands = 0 : i64, tpu.core_type = #tpu.core_type<tc>, window_params = [{pipeline_mode = #tpu.pipeline_mode<synchronous>, transform_indices = @transform_0, window_bounds = array<i64: 4, 1>}, {transform_indices = @transform_1, window_bounds = array<i64: 1, 8, 3, 4, 32>}, {transform_indices = @transform_2, window_bounds = array<i64: 1, 3, 32, 32>}, {transform_indices = @transform_3, window_bounds = array<i64: 1, 1, 32>}, {transform_indices = @transform_4, window_bounds = array<i64: 1, 8, 4, 32>}, {transform_indices = @transform_5, window_bounds = array<i64: 1, 4, 32>}]} {
    %c0_i32 = arith.constant 0 : i32
    %0 = arith.cmpi eq, %arg1, %c0_i32 : i32
    %1 = arith.extui %0 : i1 to i32
    %c0_i32_0 = arith.constant 0 : i32
    %2 = arith.cmpi ne, %1, %c0_i32_0 : i32
    scf.if %2 {
      %cst_161 = arith.constant 0.000000e+00 : f32
      %447 = vector.broadcast %cst_161 : f32 to vector<4x32xf32>
      %c0_162 = arith.constant 0 : index
      %c0_163 = arith.constant 0 : index
      %c0_164 = arith.constant 0 : index
      %448 = vector.load %arg7[%c0_162, %c0_163, %c0_164] : memref<1x4x32xf32, #tpu.memory_space<vmem>>, vector<1x4x32xf32>
      %449 = vector.shape_cast %448 : vector<1x4x32xf32> to vector<4x32xf32>
      %450 = vector.shape_cast %447 : vector<4x32xf32> to vector<1x4x32xf32>
      tpu.vector_store %arg7[%c0_162, %c0_163, %c0_164], %450 {strides = array<i32>} : memref<1x4x32xf32, #tpu.memory_space<vmem>>, vector<1x4x32xf32>,
    } else {
    }
    %c0 = arith.constant 0 : index
    %c0_1 = arith.constant 0 : index
    %c0_2 = arith.constant 0 : index
    %c0_3 = arith.constant 0 : index
    %3 = vector.load %arg4[%c0, %c0_1, %c0_2, %c0_3] : memref<1x3x32x32xf32, #tpu.memory_space<vmem>>, vector<1x1x32x32xf32>
    %4 = vector.shape_cast %3 : vector<1x1x32x32xf32> to vector<32x32xf32>
    %c0_4 = arith.constant 0 : index
    %c1 = arith.constant 1 : index
    %c0_5 = arith.constant 0 : index
    %c0_6 = arith.constant 0 : index
    %5 = vector.load %arg4[%c0_4, %c1, %c0_5, %c0_6] : memref<1x3x32x32xf32, #tpu.memory_space<vmem>>, vector<1x1x32x32xf32>
    %6 = vector.shape_cast %5 : vector<1x1x32x32xf32> to vector<32x32xf32>
    %c0_7 = arith.constant 0 : index
    %c2 = arith.constant 2 : index
    %c0_8 = arith.constant 0 : index
    %c0_9 = arith.constant 0 : index
    %7 = vector.load %arg4[%c0_7, %c2, %c0_8, %c0_9] : memref<1x3x32x32xf32, #tpu.memory_space<vmem>>, vector<1x1x32x32xf32>
    %8 = vector.shape_cast %7 : vector<1x1x32x32xf32> to vector<32x32xf32>
    %c0_10 = arith.constant 0 : index
    %c0_11 = arith.constant 0 : index
    %c0_12 = arith.constant 0 : index
    %9 = vector.load %arg5[%c0_10, %c0_11, %c0_12] : memref<1x1x32xf32, #tpu.memory_space<vmem>>, vector<1x1x32xf32>
    %10 = vector.shape_cast %9 : vector<1x1x32xf32> to vector<1x32xf32>
    %c0_13 = arith.constant 0 : index
    %c0_14 = arith.constant 0 : index
    %11 = vector.load %arg2[%c0_13, %c0_14] : memref<4x1xi32, #tpu.memory_space<vmem>>, vector<4x1xi32>
    %c0_i32_15 = arith.constant 0 : i32
    %12 = arith.muli %arg0, %c0_i32_15 : i32
    %c2_i32 = arith.constant 2 : i32
    %13 = arith.muli %c2_i32, %arg0 : i32
    %c1_i32 = arith.constant 1 : i32
    %14 = arith.subi %c1_i32, %13 : i32
    %15 = arith.muli %14, %arg1 : i32
    %16 = arith.addi %12, %15 : i32
    %c8_i32 = arith.constant 8 : i32
    %17 = arith.muli %16, %c8_i32 : i32
    %c0_16 = arith.constant 0 : index
    %c0_17 = arith.constant 0 : index
    %c0_18 = arith.constant 0 : index
    %18 = vector.load %arg7[%c0_16, %c0_17, %c0_18] : memref<1x4x32xf32, #tpu.memory_space<vmem>>, vector<1x4x32xf32>
    %19 = vector.shape_cast %18 : vector<1x4x32xf32> to vector<4x32xf32>
    %c0_i32_19 = arith.constant 0 : i32
    %c7_i32 = arith.constant 7 : i32
    %20 = arith.muli %arg0, %c7_i32 : i32
    %c2_i32_20 = arith.constant 2 : i32
    %21 = arith.muli %c2_i32_20, %arg0 : i32
    %c1_i32_21 = arith.constant 1 : i32
    %22 = arith.subi %c1_i32_21, %21 : i32
    %23 = arith.muli %22, %c0_i32_19 : i32
    %24 = arith.addi %20, %23 : i32
    %25 = arith.addi %17, %24 : i32
    %c0_22 = arith.constant 0 : index
    %26 = arith.index_cast %24 : i32 to index
    %c0_23 = arith.constant 0 : index
    %c0_24 = arith.constant 0 : index
    %c0_25 = arith.constant 0 : index
    %27 = vector.load %arg3[%c0_22, %26, %c0_23, %c0_24, %c0_25] : memref<1x8x3x4x32xf32, #tpu.memory_space<vmem>>, vector<1x1x3x4x32xf32>
    %28 = vector.shape_cast %27 : vector<1x1x3x4x32xf32> to vector<3x4x32xf32>
    %cst = arith.constant dense<0.000000e+00> : vector<4x32xf32>
    %29 = tpu.matmul %19, %4, %cst {dimension_numbers = #tpu.dot_dimension_numbers<[1], [0], [0], [1], [0, 0, 1, 1], [], []>} : vector<4x32xf32>, vector<32x32xf32>, vector<4x32xf32> -> vector<4x32xf32>
    %cst_26 = arith.constant dense<0.000000e+00> : vector<4x32xf32>
    %30 = tpu.matmul %19, %6, %cst_26 {dimension_numbers = #tpu.dot_dimension_numbers<[1], [0], [0], [1], [0, 0, 1, 1], [], []>} : vector<4x32xf32>, vector<32x32xf32>, vector<4x32xf32> -> vector<4x32xf32>
    %cst_27 = arith.constant dense<0.000000e+00> : vector<4x32xf32>
    %31 = tpu.matmul %19, %8, %cst_27 {dimension_numbers = #tpu.dot_dimension_numbers<[1], [0], [0], [1], [0, 0, 1, 1], [], []>} : vector<4x32xf32>, vector<32x32xf32>, vector<4x32xf32> -> vector<4x32xf32>
    %32 = vector.broadcast %10 : vector<1x32xf32> to vector<4x32xf32>
    %33 = arith.addf %31, %32 : vector<4x32xf32>
    %34 = vector.extract_strided_slice %28 {offsets = [0, 0, 0], sizes = [1, 4, 32], strides = [1, 1, 1]} : vector<3x4x32xf32> to vector<1x4x32xf32>
    %35 = vector.shape_cast %34 : vector<1x4x32xf32> to vector<4x32xf32>
    %36 = arith.addf %35, %29 : vector<4x32xf32>
    %37 = arith.negf %36 : vector<4x32xf32>
    %38 = math.exp %37 : vector<4x32xf32>
    %cst_28 = arith.constant 1.000000e+00 : f32
    %39 = vector.broadcast %cst_28 : f32 to vector<4x32xf32>
    %40 = arith.addf %39, %38 : vector<4x32xf32>
    %41 = arith.divf %39, %40 : vector<4x32xf32>
    %42 = vector.extract_strided_slice %28 {offsets = [1, 0, 0], sizes = [1, 4, 32], strides = [1, 1, 1]} : vector<3x4x32xf32> to vector<1x4x32xf32>
    %43 = vector.shape_cast %42 : vector<1x4x32xf32> to vector<4x32xf32>
    %44 = arith.addf %43, %30 : vector<4x32xf32>
    %45 = arith.negf %44 : vector<4x32xf32>
    %46 = math.exp %45 : vector<4x32xf32>
    %cst_29 = arith.constant 1.000000e+00 : f32
    %47 = vector.broadcast %cst_29 : f32 to vector<4x32xf32>
    %48 = arith.addf %47, %46 : vector<4x32xf32>
    %49 = arith.divf %47, %48 : vector<4x32xf32>
    %50 = vector.extract_strided_slice %28 {offsets = [2, 0, 0], sizes = [1, 4, 32], strides = [1, 1, 1]} : vector<3x4x32xf32> to vector<1x4x32xf32>
    %51 = vector.shape_cast %50 : vector<1x4x32xf32> to vector<4x32xf32>
    %52 = arith.mulf %41, %33 : vector<4x32xf32>
    %53 = arith.addf %51, %52 : vector<4x32xf32>
    %54 = math.tanh %53 : vector<4x32xf32>
    %cst_30 = arith.constant 1.000000e+00 : f32
    %55 = vector.broadcast %cst_30 : f32 to vector<4x32xf32>
    %56 = arith.subf %55, %49 : vector<4x32xf32>
    %57 = arith.mulf %56, %54 : vector<4x32xf32>
    %58 = arith.mulf %49, %19 : vector<4x32xf32>
    %59 = arith.addf %57, %58 : vector<4x32xf32>
    %60 = vector.broadcast %25 : i32 to vector<4x1xi32>
    %61 = arith.cmpi slt, %60, %11 : vector<4x1xi32>
    %cst_31 = arith.constant 0.000000e+00 : f32
    %62 = vector.shape_cast %61 : vector<4x1xi1> to vector<4x1xi1>
    %63 = vector.broadcast %62 : vector<4x1xi1> to vector<4x32xi1>
    %64 = vector.broadcast %cst_31 : f32 to vector<4x32xf32>
    %65 = arith.select %63, %59, %64 : vector<4x32xi1>, vector<4x32xf32>
    %c0_32 = arith.constant 0 : index
    %66 = arith.index_cast %24 : i32 to index
    %c0_33 = arith.constant 0 : index
    %c0_34 = arith.constant 0 : index
    %67 = vector.load %arg6[%c0_32, %66, %c0_33, %c0_34] : memref<1x8x4x32xf32, #tpu.memory_space<vmem>>, vector<1x1x4x32xf32>
    %68 = vector.shape_cast %67 : vector<1x1x4x32xf32> to vector<4x32xf32>
    %69 = vector.shape_cast %65 : vector<4x32xf32> to vector<1x1x4x32xf32>
    tpu.vector_store %arg6[%c0_32, %66, %c0_33, %c0_34], %69 {strides = array<i32>} : memref<1x8x4x32xf32, #tpu.memory_space<vmem>>, vector<1x1x4x32xf32>,
    %70 = vector.shape_cast %61 : vector<4x1xi1> to vector<4x1xi1>
    %71 = vector.broadcast %70 : vector<4x1xi1> to vector<4x32xi1>
    %72 = arith.select %71, %59, %19 : vector<4x32xi1>, vector<4x32xf32>
    %c1_i32_35 = arith.constant 1 : i32
    %c7_i32_36 = arith.constant 7 : i32
    %73 = arith.muli %arg0, %c7_i32_36 : i32
    %c2_i32_37 = arith.constant 2 : i32
    %74 = arith.muli %c2_i32_37, %arg0 : i32
    %c1_i32_38 = arith.constant 1 : i32
    %75 = arith.subi %c1_i32_38, %74 : i32
    %76 = arith.muli %75, %c1_i32_35 : i32
    %77 = arith.addi %73, %76 : i32
    %78 = arith.addi %17, %77 : i32
    %c0_39 = arith.constant 0 : index
    %79 = arith.index_cast %77 : i32 to index
    %c0_40 = arith.constant 0 : index
    %c0_41 = arith.constant 0 : index
    %c0_42 = arith.constant 0 : index
    %80 = vector.load %arg3[%c0_39, %79, %c0_40, %c0_41, %c0_42] : memref<1x8x3x4x32xf32, #tpu.memory_space<vmem>>, vector<1x1x3x4x32xf32>
    %81 = vector.shape_cast %80 : vector<1x1x3x4x32xf32> to vector<3x4x32xf32>
    %cst_43 = arith.constant dense<0.000000e+00> : vector<4x32xf32>
    %82 = tpu.matmul %72, %4, %cst_43 {dimension_numbers = #tpu.dot_dimension_numbers<[1], [0], [0], [1], [0, 0, 1, 1], [], []>} : vector<4x32xf32>, vector<32x32xf32>, vector<4x32xf32> -> vector<4x32xf32>
    %cst_44 = arith.constant dense<0.000000e+00> : vector<4x32xf32>
    %83 = tpu.matmul %72, %6, %cst_44 {dimension_numbers = #tpu.dot_dimension_numbers<[1], [0], [0], [1], [0, 0, 1, 1], [], []>} : vector<4x32xf32>, vector<32x32xf32>, vector<4x32xf32> -> vector<4x32xf32>
    %cst_45 = arith.constant dense<0.000000e+00> : vector<4x32xf32>
    %84 = tpu.matmul %72, %8, %cst_45 {dimension_numbers = #tpu.dot_dimension_numbers<[1], [0], [0], [1], [0, 0, 1, 1], [], []>} : vector<4x32xf32>, vector<32x32xf32>, vector<4x32xf32> -> vector<4x32xf32>
    %85 = vector.broadcast %10 : vector<1x32xf32> to vector<4x32xf32>
    %86 = arith.addf %84, %85 : vector<4x32xf32>
    %87 = vector.extract_strided_slice %81 {offsets = [0, 0, 0], sizes = [1, 4, 32], strides = [1, 1, 1]} : vector<3x4x32xf32> to vector<1x4x32xf32>
    %88 = vector.shape_cast %87 : vector<1x4x32xf32> to vector<4x32xf32>
    %89 = arith.addf %88, %82 : vector<4x32xf32>
    %90 = arith.negf %89 : vector<4x32xf32>
    %91 = math.exp %90 : vector<4x32xf32>
    %cst_46 = arith.constant 1.000000e+00 : f32
    %92 = vector.broadcast %cst_46 : f32 to vector<4x32xf32>
    %93 = arith.addf %92, %91 : vector<4x32xf32>
    %94 = arith.divf %92, %93 : vector<4x32xf32>
    %95 = vector.extract_strided_slice %81 {offsets = [1, 0, 0], sizes = [1, 4, 32], strides = [1, 1, 1]} : vector<3x4x32xf32> to vector<1x4x32xf32>
    %96 = vector.shape_cast %95 : vector<1x4x32xf32> to vector<4x32xf32>
    %97 = arith.addf %96, %83 : vector<4x32xf32>
    %98 = arith.negf %97 : vector<4x32xf32>
    %99 = math.exp %98 : vector<4x32xf32>
    %cst_47 = arith.constant 1.000000e+00 : f32
    %100 = vector.broadcast %cst_47 : f32 to vector<4x32xf32>
    %101 = arith.addf %100, %99 : vector<4x32xf32>
    %102 = arith.divf %100, %101 : vector<4x32xf32>
    %103 = vector.extract_strided_slice %81 {offsets = [2, 0, 0], sizes = [1, 4, 32], strides = [1, 1, 1]} : vector<3x4x32xf32> to vector<1x4x32xf32>
    %104 = vector.shape_cast %103 : vector<1x4x32xf32> to vector<4x32xf32>
    %105 = arith.mulf %94, %86 : vector<4x32xf32>
    %106 = arith.addf %104, %105 : vector<4x32xf32>
    %107 = math.tanh %106 : vector<4x32xf32>
    %cst_48 = arith.constant 1.000000e+00 : f32
    %108 = vector.broadcast %cst_48 : f32 to vector<4x32xf32>
    %109 = arith.subf %108, %102 : vector<4x32xf32>
    %110 = arith.mulf %109, %107 : vector<4x32xf32>
    %111 = arith.mulf %102, %72 : vector<4x32xf32>
    %112 = arith.addf %110, %111 : vector<4x32xf32>
    %113 = vector.broadcast %78 : i32 to vector<4x1xi32>
    %114 = arith.cmpi slt, %113, %11 : vector<4x1xi32>
    %cst_49 = arith.constant 0.000000e+00 : f32
    %115 = vector.shape_cast %114 : vector<4x1xi1> to vector<4x1xi1>
    %116 = vector.broadcast %115 : vector<4x1xi1> to vector<4x32xi1>
    %117 = vector.broadcast %cst_49 : f32 to vector<4x32xf32>
    %118 = arith.select %116, %112, %117 : vector<4x32xi1>, vector<4x32xf32>
    %c0_50 = arith.constant 0 : index
    %119 = arith.index_cast %77 : i32 to index
    %c0_51 = arith.constant 0 : index
    %c0_52 = arith.constant 0 : index
    %120 = vector.load %arg6[%c0_50, %119, %c0_51, %c0_52] : memref<1x8x4x32xf32, #tpu.memory_space<vmem>>, vector<1x1x4x32xf32>
    %121 = vector.shape_cast %120 : vector<1x1x4x32xf32> to vector<4x32xf32>
    %122 = vector.shape_cast %118 : vector<4x32xf32> to vector<1x1x4x32xf32>
    tpu.vector_store %arg6[%c0_50, %119, %c0_51, %c0_52], %122 {strides = array<i32>} : memref<1x8x4x32xf32, #tpu.memory_space<vmem>>, vector<1x1x4x32xf32>,
    %123 = vector.shape_cast %114 : vector<4x1xi1> to vector<4x1xi1>
    %124 = vector.broadcast %123 : vector<4x1xi1> to vector<4x32xi1>
    %125 = arith.select %124, %112, %72 : vector<4x32xi1>, vector<4x32xf32>
    %c2_i32_53 = arith.constant 2 : i32
    %c7_i32_54 = arith.constant 7 : i32
    %126 = arith.muli %arg0, %c7_i32_54 : i32
    %c2_i32_55 = arith.constant 2 : i32
    %127 = arith.muli %c2_i32_55, %arg0 : i32
    %c1_i32_56 = arith.constant 1 : i32
    %128 = arith.subi %c1_i32_56, %127 : i32
    %129 = arith.muli %128, %c2_i32_53 : i32
    %130 = arith.addi %126, %129 : i32
    %131 = arith.addi %17, %130 : i32
    %c0_57 = arith.constant 0 : index
    %132 = arith.index_cast %130 : i32 to index
    %c0_58 = arith.constant 0 : index
    %c0_59 = arith.constant 0 : index
    %c0_60 = arith.constant 0 : index
    %133 = vector.load %arg3[%c0_57, %132, %c0_58, %c0_59, %c0_60] : memref<1x8x3x4x32xf32, #tpu.memory_space<vmem>>, vector<1x1x3x4x32xf32>
    %134 = vector.shape_cast %133 : vector<1x1x3x4x32xf32> to vector<3x4x32xf32>
    %cst_61 = arith.constant dense<0.000000e+00> : vector<4x32xf32>
    %135 = tpu.matmul %125, %4, %cst_61 {dimension_numbers = #tpu.dot_dimension_numbers<[1], [0], [0], [1], [0, 0, 1, 1], [], []>} : vector<4x32xf32>, vector<32x32xf32>, vector<4x32xf32> -> vector<4x32xf32>
    %cst_62 = arith.constant dense<0.000000e+00> : vector<4x32xf32>
    %136 = tpu.matmul %125, %6, %cst_62 {dimension_numbers = #tpu.dot_dimension_numbers<[1], [0], [0], [1], [0, 0, 1, 1], [], []>} : vector<4x32xf32>, vector<32x32xf32>, vector<4x32xf32> -> vector<4x32xf32>
    %cst_63 = arith.constant dense<0.000000e+00> : vector<4x32xf32>
    %137 = tpu.matmul %125, %8, %cst_63 {dimension_numbers = #tpu.dot_dimension_numbers<[1], [0], [0], [1], [0, 0, 1, 1], [], []>} : vector<4x32xf32>, vector<32x32xf32>, vector<4x32xf32> -> vector<4x32xf32>
    %138 = vector.broadcast %10 : vector<1x32xf32> to vector<4x32xf32>
    %139 = arith.addf %137, %138 : vector<4x32xf32>
    %140 = vector.extract_strided_slice %134 {offsets = [0, 0, 0], sizes = [1, 4, 32], strides = [1, 1, 1]} : vector<3x4x32xf32> to vector<1x4x32xf32>
    %141 = vector.shape_cast %140 : vector<1x4x32xf32> to vector<4x32xf32>
    %142 = arith.addf %141, %135 : vector<4x32xf32>
    %143 = arith.negf %142 : vector<4x32xf32>
    %144 = math.exp %143 : vector<4x32xf32>
    %cst_64 = arith.constant 1.000000e+00 : f32
    %145 = vector.broadcast %cst_64 : f32 to vector<4x32xf32>
    %146 = arith.addf %145, %144 : vector<4x32xf32>
    %147 = arith.divf %145, %146 : vector<4x32xf32>
    %148 = vector.extract_strided_slice %134 {offsets = [1, 0, 0], sizes = [1, 4, 32], strides = [1, 1, 1]} : vector<3x4x32xf32> to vector<1x4x32xf32>
    %149 = vector.shape_cast %148 : vector<1x4x32xf32> to vector<4x32xf32>
    %150 = arith.addf %149, %136 : vector<4x32xf32>
    %151 = arith.negf %150 : vector<4x32xf32>
    %152 = math.exp %151 : vector<4x32xf32>
    %cst_65 = arith.constant 1.000000e+00 : f32
    %153 = vector.broadcast %cst_65 : f32 to vector<4x32xf32>
    %154 = arith.addf %153, %152 : vector<4x32xf32>
    %155 = arith.divf %153, %154 : vector<4x32xf32>
    %156 = vector.extract_strided_slice %134 {offsets = [2, 0, 0], sizes = [1, 4, 32], strides = [1, 1, 1]} : vector<3x4x32xf32> to vector<1x4x32xf32>
    %157 = vector.shape_cast %156 : vector<1x4x32xf32> to vector<4x32xf32>
    %158 = arith.mulf %147, %139 : vector<4x32xf32>
    %159 = arith.addf %157, %158 : vector<4x32xf32>
    %160 = math.tanh %159 : vector<4x32xf32>
    %cst_66 = arith.constant 1.000000e+00 : f32
    %161 = vector.broadcast %cst_66 : f32 to vector<4x32xf32>
    %162 = arith.subf %161, %155 : vector<4x32xf32>
    %163 = arith.mulf %162, %160 : vector<4x32xf32>
    %164 = arith.mulf %155, %125 : vector<4x32xf32>
    %165 = arith.addf %163, %164 : vector<4x32xf32>
    %166 = vector.broadcast %131 : i32 to vector<4x1xi32>
    %167 = arith.cmpi slt, %166, %11 : vector<4x1xi32>
    %cst_67 = arith.constant 0.000000e+00 : f32
    %168 = vector.shape_cast %167 : vector<4x1xi1> to vector<4x1xi1>
    %169 = vector.broadcast %168 : vector<4x1xi1> to vector<4x32xi1>
    %170 = vector.broadcast %cst_67 : f32 to vector<4x32xf32>
    %171 = arith.select %169, %165, %170 : vector<4x32xi1>, vector<4x32xf32>
    %c0_68 = arith.constant 0 : index
    %172 = arith.index_cast %130 : i32 to index
    %c0_69 = arith.constant 0 : index
    %c0_70 = arith.constant 0 : index
    %173 = vector.load %arg6[%c0_68, %172, %c0_69, %c0_70] : memref<1x8x4x32xf32, #tpu.memory_space<vmem>>, vector<1x1x4x32xf32>
    %174 = vector.shape_cast %173 : vector<1x1x4x32xf32> to vector<4x32xf32>
    %175 = vector.shape_cast %171 : vector<4x32xf32> to vector<1x1x4x32xf32>
    tpu.vector_store %arg6[%c0_68, %172, %c0_69, %c0_70], %175 {strides = array<i32>} : memref<1x8x4x32xf32, #tpu.memory_space<vmem>>, vector<1x1x4x32xf32>,
    %176 = vector.shape_cast %167 : vector<4x1xi1> to vector<4x1xi1>
    %177 = vector.broadcast %176 : vector<4x1xi1> to vector<4x32xi1>
    %178 = arith.select %177, %165, %125 : vector<4x32xi1>, vector<4x32xf32>
    %c3_i32 = arith.constant 3 : i32
    %c7_i32_71 = arith.constant 7 : i32
    %179 = arith.muli %arg0, %c7_i32_71 : i32
    %c2_i32_72 = arith.constant 2 : i32
    %180 = arith.muli %c2_i32_72, %arg0 : i32
    %c1_i32_73 = arith.constant 1 : i32
    %181 = arith.subi %c1_i32_73, %180 : i32
    %182 = arith.muli %181, %c3_i32 : i32
    %183 = arith.addi %179, %182 : i32
    %184 = arith.addi %17, %183 : i32
    %c0_74 = arith.constant 0 : index
    %185 = arith.index_cast %183 : i32 to index
    %c0_75 = arith.constant 0 : index
    %c0_76 = arith.constant 0 : index
    %c0_77 = arith.constant 0 : index
    %186 = vector.load %arg3[%c0_74, %185, %c0_75, %c0_76, %c0_77] : memref<1x8x3x4x32xf32, #tpu.memory_space<vmem>>, vector<1x1x3x4x32xf32>
    %187 = vector.shape_cast %186 : vector<1x1x3x4x32xf32> to vector<3x4x32xf32>
    %cst_78 = arith.constant dense<0.000000e+00> : vector<4x32xf32>
    %188 = tpu.matmul %178, %4, %cst_78 {dimension_numbers = #tpu.dot_dimension_numbers<[1], [0], [0], [1], [0, 0, 1, 1], [], []>} : vector<4x32xf32>, vector<32x32xf32>, vector<4x32xf32> -> vector<4x32xf32>
    %cst_79 = arith.constant dense<0.000000e+00> : vector<4x32xf32>
    %189 = tpu.matmul %178, %6, %cst_79 {dimension_numbers = #tpu.dot_dimension_numbers<[1], [0], [0], [1], [0, 0, 1, 1], [], []>} : vector<4x32xf32>, vector<32x32xf32>, vector<4x32xf32> -> vector<4x32xf32>
    %cst_80 = arith.constant dense<0.000000e+00> : vector<4x32xf32>
    %190 = tpu.matmul %178, %8, %cst_80 {dimension_numbers = #tpu.dot_dimension_numbers<[1], [0], [0], [1], [0, 0, 1, 1], [], []>} : vector<4x32xf32>, vector<32x32xf32>, vector<4x32xf32> -> vector<4x32xf32>
    %191 = vector.broadcast %10 : vector<1x32xf32> to vector<4x32xf32>
    %192 = arith.addf %190, %191 : vector<4x32xf32>
    %193 = vector.extract_strided_slice %187 {offsets = [0, 0, 0], sizes = [1, 4, 32], strides = [1, 1, 1]} : vector<3x4x32xf32> to vector<1x4x32xf32>
    %194 = vector.shape_cast %193 : vector<1x4x32xf32> to vector<4x32xf32>
    %195 = arith.addf %194, %188 : vector<4x32xf32>
    %196 = arith.negf %195 : vector<4x32xf32>
    %197 = math.exp %196 : vector<4x32xf32>
    %cst_81 = arith.constant 1.000000e+00 : f32
    %198 = vector.broadcast %cst_81 : f32 to vector<4x32xf32>
    %199 = arith.addf %198, %197 : vector<4x32xf32>
    %200 = arith.divf %198, %199 : vector<4x32xf32>
    %201 = vector.extract_strided_slice %187 {offsets = [1, 0, 0], sizes = [1, 4, 32], strides = [1, 1, 1]} : vector<3x4x32xf32> to vector<1x4x32xf32>
    %202 = vector.shape_cast %201 : vector<1x4x32xf32> to vector<4x32xf32>
    %203 = arith.addf %202, %189 : vector<4x32xf32>
    %204 = arith.negf %203 : vector<4x32xf32>
    %205 = math.exp %204 : vector<4x32xf32>
    %cst_82 = arith.constant 1.000000e+00 : f32
    %206 = vector.broadcast %cst_82 : f32 to vector<4x32xf32>
    %207 = arith.addf %206, %205 : vector<4x32xf32>
    %208 = arith.divf %206, %207 : vector<4x32xf32>
    %209 = vector.extract_strided_slice %187 {offsets = [2, 0, 0], sizes = [1, 4, 32], strides = [1, 1, 1]} : vector<3x4x32xf32> to vector<1x4x32xf32>
    %210 = vector.shape_cast %209 : vector<1x4x32xf32> to vector<4x32xf32>
    %211 = arith.mulf %200, %192 : vector<4x32xf32>
    %212 = arith.addf %210, %211 : vector<4x32xf32>
    %213 = math.tanh %212 : vector<4x32xf32>
    %cst_83 = arith.constant 1.000000e+00 : f32
    %214 = vector.broadcast %cst_83 : f32 to vector<4x32xf32>
    %215 = arith.subf %214, %208 : vector<4x32xf32>
    %216 = arith.mulf %215, %213 : vector<4x32xf32>
    %217 = arith.mulf %208, %178 : vector<4x32xf32>
    %218 = arith.addf %216, %217 : vector<4x32xf32>
    %219 = vector.broadcast %184 : i32 to vector<4x1xi32>
    %220 = arith.cmpi slt, %219, %11 : vector<4x1xi32>
    %cst_84 = arith.constant 0.000000e+00 : f32
    %221 = vector.shape_cast %220 : vector<4x1xi1> to vector<4x1xi1>
    %222 = vector.broadcast %221 : vector<4x1xi1> to vector<4x32xi1>
    %223 = vector.broadcast %cst_84 : f32 to vector<4x32xf32>
    %224 = arith.select %222, %218, %223 : vector<4x32xi1>, vector<4x32xf32>
    %c0_85 = arith.constant 0 : index
    %225 = arith.index_cast %183 : i32 to index
    %c0_86 = arith.constant 0 : index
    %c0_87 = arith.constant 0 : index
    %226 = vector.load %arg6[%c0_85, %225, %c0_86, %c0_87] : memref<1x8x4x32xf32, #tpu.memory_space<vmem>>, vector<1x1x4x32xf32>
    %227 = vector.shape_cast %226 : vector<1x1x4x32xf32> to vector<4x32xf32>
    %228 = vector.shape_cast %224 : vector<4x32xf32> to vector<1x1x4x32xf32>
    tpu.vector_store %arg6[%c0_85, %225, %c0_86, %c0_87], %228 {strides = array<i32>} : memref<1x8x4x32xf32, #tpu.memory_space<vmem>>, vector<1x1x4x32xf32>,
    %229 = vector.shape_cast %220 : vector<4x1xi1> to vector<4x1xi1>
    %230 = vector.broadcast %229 : vector<4x1xi1> to vector<4x32xi1>
    %231 = arith.select %230, %218, %178 : vector<4x32xi1>, vector<4x32xf32>
    %c4_i32 = arith.constant 4 : i32
    %c7_i32_88 = arith.constant 7 : i32
    %232 = arith.muli %arg0, %c7_i32_88 : i32
    %c2_i32_89 = arith.constant 2 : i32
    %233 = arith.muli %c2_i32_89, %arg0 : i32
    %c1_i32_90 = arith.constant 1 : i32
    %234 = arith.subi %c1_i32_90, %233 : i32
    %235 = arith.muli %234, %c4_i32 : i32
    %236 = arith.addi %232, %235 : i32
    %237 = arith.addi %17, %236 : i32
    %c0_91 = arith.constant 0 : index
    %238 = arith.index_cast %236 : i32 to index
    %c0_92 = arith.constant 0 : index
    %c0_93 = arith.constant 0 : index
    %c0_94 = arith.constant 0 : index
    %239 = vector.load %arg3[%c0_91, %238, %c0_92, %c0_93, %c0_94] : memref<1x8x3x4x32xf32, #tpu.memory_space<vmem>>, vector<1x1x3x4x32xf32>
    %240 = vector.shape_cast %239 : vector<1x1x3x4x32xf32> to vector<3x4x32xf32>
    %cst_95 = arith.constant dense<0.000000e+00> : vector<4x32xf32>
    %241 = tpu.matmul %231, %4, %cst_95 {dimension_numbers = #tpu.dot_dimension_numbers<[1], [0], [0], [1], [0, 0, 1, 1], [], []>} : vector<4x32xf32>, vector<32x32xf32>, vector<4x32xf32> -> vector<4x32xf32>
    %cst_96 = arith.constant dense<0.000000e+00> : vector<4x32xf32>
    %242 = tpu.matmul %231, %6, %cst_96 {dimension_numbers = #tpu.dot_dimension_numbers<[1], [0], [0], [1], [0, 0, 1, 1], [], []>} : vector<4x32xf32>, vector<32x32xf32>, vector<4x32xf32> -> vector<4x32xf32>
    %cst_97 = arith.constant dense<0.000000e+00> : vector<4x32xf32>
    %243 = tpu.matmul %231, %8, %cst_97 {dimension_numbers = #tpu.dot_dimension_numbers<[1], [0], [0], [1], [0, 0, 1, 1], [], []>} : vector<4x32xf32>, vector<32x32xf32>, vector<4x32xf32> -> vector<4x32xf32>
    %244 = vector.broadcast %10 : vector<1x32xf32> to vector<4x32xf32>
    %245 = arith.addf %243, %244 : vector<4x32xf32>
    %246 = vector.extract_strided_slice %240 {offsets = [0, 0, 0], sizes = [1, 4, 32], strides = [1, 1, 1]} : vector<3x4x32xf32> to vector<1x4x32xf32>
    %247 = vector.shape_cast %246 : vector<1x4x32xf32> to vector<4x32xf32>
    %248 = arith.addf %247, %241 : vector<4x32xf32>
    %249 = arith.negf %248 : vector<4x32xf32>
    %250 = math.exp %249 : vector<4x32xf32>
    %cst_98 = arith.constant 1.000000e+00 : f32
    %251 = vector.broadcast %cst_98 : f32 to vector<4x32xf32>
    %252 = arith.addf %251, %250 : vector<4x32xf32>
    %253 = arith.divf %251, %252 : vector<4x32xf32>
    %254 = vector.extract_strided_slice %240 {offsets = [1, 0, 0], sizes = [1, 4, 32], strides = [1, 1, 1]} : vector<3x4x32xf32> to vector<1x4x32xf32>
    %255 = vector.shape_cast %254 : vector<1x4x32xf32> to vector<4x32xf32>
    %256 = arith.addf %255, %242 : vector<4x32xf32>
    %257 = arith.negf %256 : vector<4x32xf32>
    %258 = math.exp %257 : vector<4x32xf32>
    %cst_99 = arith.constant 1.000000e+00 : f32
    %259 = vector.broadcast %cst_99 : f32 to vector<4x32xf32>
    %260 = arith.addf %259, %258 : vector<4x32xf32>
    %261 = arith.divf %259, %260 : vector<4x32xf32>
    %262 = vector.extract_strided_slice %240 {offsets = [2, 0, 0], sizes = [1, 4, 32], strides = [1, 1, 1]} : vector<3x4x32xf32> to vector<1x4x32xf32>
    %263 = vector.shape_cast %262 : vector<1x4x32xf32> to vector<4x32xf32>
    %264 = arith.mulf %253, %245 : vector<4x32xf32>
    %265 = arith.addf %263, %264 : vector<4x32xf32>
    %266 = math.tanh %265 : vector<4x32xf32>
    %cst_100 = arith.constant 1.000000e+00 : f32
    %267 = vector.broadcast %cst_100 : f32 to vector<4x32xf32>
    %268 = arith.subf %267, %261 : vector<4x32xf32>
    %269 = arith.mulf %268, %266 : vector<4x32xf32>
    %270 = arith.mulf %261, %231 : vector<4x32xf32>
    %271 = arith.addf %269, %270 : vector<4x32xf32>
    %272 = vector.broadcast %237 : i32 to vector<4x1xi32>
    %273 = arith.cmpi slt, %272, %11 : vector<4x1xi32>
    %cst_101 = arith.constant 0.000000e+00 : f32
    %274 = vector.shape_cast %273 : vector<4x1xi1> to vector<4x1xi1>
    %275 = vector.broadcast %274 : vector<4x1xi1> to vector<4x32xi1>
    %276 = vector.broadcast %cst_101 : f32 to vector<4x32xf32>
    %277 = arith.select %275, %271, %276 : vector<4x32xi1>, vector<4x32xf32>
    %c0_102 = arith.constant 0 : index
    %278 = arith.index_cast %236 : i32 to index
    %c0_103 = arith.constant 0 : index
    %c0_104 = arith.constant 0 : index
    %279 = vector.load %arg6[%c0_102, %278, %c0_103, %c0_104] : memref<1x8x4x32xf32, #tpu.memory_space<vmem>>, vector<1x1x4x32xf32>
    %280 = vector.shape_cast %279 : vector<1x1x4x32xf32> to vector<4x32xf32>
    %281 = vector.shape_cast %277 : vector<4x32xf32> to vector<1x1x4x32xf32>
    tpu.vector_store %arg6[%c0_102, %278, %c0_103, %c0_104], %281 {strides = array<i32>} : memref<1x8x4x32xf32, #tpu.memory_space<vmem>>, vector<1x1x4x32xf32>,
    %282 = vector.shape_cast %273 : vector<4x1xi1> to vector<4x1xi1>
    %283 = vector.broadcast %282 : vector<4x1xi1> to vector<4x32xi1>
    %284 = arith.select %283, %271, %231 : vector<4x32xi1>, vector<4x32xf32>
    %c5_i32 = arith.constant 5 : i32
    %c7_i32_105 = arith.constant 7 : i32
    %285 = arith.muli %arg0, %c7_i32_105 : i32
    %c2_i32_106 = arith.constant 2 : i32
    %286 = arith.muli %c2_i32_106, %arg0 : i32
    %c1_i32_107 = arith.constant 1 : i32
    %287 = arith.subi %c1_i32_107, %286 : i32
    %288 = arith.muli %287, %c5_i32 : i32
    %289 = arith.addi %285, %288 : i32
    %290 = arith.addi %17, %289 : i32
    %c0_108 = arith.constant 0 : index
    %291 = arith.index_cast %289 : i32 to index
    %c0_109 = arith.constant 0 : index
    %c0_110 = arith.constant 0 : index
    %c0_111 = arith.constant 0 : index
    %292 = vector.load %arg3[%c0_108, %291, %c0_109, %c0_110, %c0_111] : memref<1x8x3x4x32xf32, #tpu.memory_space<vmem>>, vector<1x1x3x4x32xf32>
    %293 = vector.shape_cast %292 : vector<1x1x3x4x32xf32> to vector<3x4x32xf32>
    %cst_112 = arith.constant dense<0.000000e+00> : vector<4x32xf32>
    %294 = tpu.matmul %284, %4, %cst_112 {dimension_numbers = #tpu.dot_dimension_numbers<[1], [0], [0], [1], [0, 0, 1, 1], [], []>} : vector<4x32xf32>, vector<32x32xf32>, vector<4x32xf32> -> vector<4x32xf32>
    %cst_113 = arith.constant dense<0.000000e+00> : vector<4x32xf32>
    %295 = tpu.matmul %284, %6, %cst_113 {dimension_numbers = #tpu.dot_dimension_numbers<[1], [0], [0], [1], [0, 0, 1, 1], [], []>} : vector<4x32xf32>, vector<32x32xf32>, vector<4x32xf32> -> vector<4x32xf32>
    %cst_114 = arith.constant dense<0.000000e+00> : vector<4x32xf32>
    %296 = tpu.matmul %284, %8, %cst_114 {dimension_numbers = #tpu.dot_dimension_numbers<[1], [0], [0], [1], [0, 0, 1, 1], [], []>} : vector<4x32xf32>, vector<32x32xf32>, vector<4x32xf32> -> vector<4x32xf32>
    %297 = vector.broadcast %10 : vector<1x32xf32> to vector<4x32xf32>
    %298 = arith.addf %296, %297 : vector<4x32xf32>
    %299 = vector.extract_strided_slice %293 {offsets = [0, 0, 0], sizes = [1, 4, 32], strides = [1, 1, 1]} : vector<3x4x32xf32> to vector<1x4x32xf32>
    %300 = vector.shape_cast %299 : vector<1x4x32xf32> to vector<4x32xf32>
    %301 = arith.addf %300, %294 : vector<4x32xf32>
    %302 = arith.negf %301 : vector<4x32xf32>
    %303 = math.exp %302 : vector<4x32xf32>
    %cst_115 = arith.constant 1.000000e+00 : f32
    %304 = vector.broadcast %cst_115 : f32 to vector<4x32xf32>
    %305 = arith.addf %304, %303 : vector<4x32xf32>
    %306 = arith.divf %304, %305 : vector<4x32xf32>
    %307 = vector.extract_strided_slice %293 {offsets = [1, 0, 0], sizes = [1, 4, 32], strides = [1, 1, 1]} : vector<3x4x32xf32> to vector<1x4x32xf32>
    %308 = vector.shape_cast %307 : vector<1x4x32xf32> to vector<4x32xf32>
    %309 = arith.addf %308, %295 : vector<4x32xf32>
    %310 = arith.negf %309 : vector<4x32xf32>
    %311 = math.exp %310 : vector<4x32xf32>
    %cst_116 = arith.constant 1.000000e+00 : f32
    %312 = vector.broadcast %cst_116 : f32 to vector<4x32xf32>
    %313 = arith.addf %312, %311 : vector<4x32xf32>
    %314 = arith.divf %312, %313 : vector<4x32xf32>
    %315 = vector.extract_strided_slice %293 {offsets = [2, 0, 0], sizes = [1, 4, 32], strides = [1, 1, 1]} : vector<3x4x32xf32> to vector<1x4x32xf32>
    %316 = vector.shape_cast %315 : vector<1x4x32xf32> to vector<4x32xf32>
    %317 = arith.mulf %306, %298 : vector<4x32xf32>
    %318 = arith.addf %316, %317 : vector<4x32xf32>
    %319 = math.tanh %318 : vector<4x32xf32>
    %cst_117 = arith.constant 1.000000e+00 : f32
    %320 = vector.broadcast %cst_117 : f32 to vector<4x32xf32>
    %321 = arith.subf %320, %314 : vector<4x32xf32>
    %322 = arith.mulf %321, %319 : vector<4x32xf32>
    %323 = arith.mulf %314, %284 : vector<4x32xf32>
    %324 = arith.addf %322, %323 : vector<4x32xf32>
    %325 = vector.broadcast %290 : i32 to vector<4x1xi32>
    %326 = arith.cmpi slt, %325, %11 : vector<4x1xi32>
    %cst_118 = arith.constant 0.000000e+00 : f32
    %327 = vector.shape_cast %326 : vector<4x1xi1> to vector<4x1xi1>
    %328 = vector.broadcast %327 : vector<4x1xi1> to vector<4x32xi1>
    %329 = vector.broadcast %cst_118 : f32 to vector<4x32xf32>
    %330 = arith.select %328, %324, %329 : vector<4x32xi1>, vector<4x32xf32>
    %c0_119 = arith.constant 0 : index
    %331 = arith.index_cast %289 : i32 to index
    %c0_120 = arith.constant 0 : index
    %c0_121 = arith.constant 0 : index
    %332 = vector.load %arg6[%c0_119, %331, %c0_120, %c0_121] : memref<1x8x4x32xf32, #tpu.memory_space<vmem>>, vector<1x1x4x32xf32>
    %333 = vector.shape_cast %332 : vector<1x1x4x32xf32> to vector<4x32xf32>
    %334 = vector.shape_cast %330 : vector<4x32xf32> to vector<1x1x4x32xf32>
    tpu.vector_store %arg6[%c0_119, %331, %c0_120, %c0_121], %334 {strides = array<i32>} : memref<1x8x4x32xf32, #tpu.memory_space<vmem>>, vector<1x1x4x32xf32>,
    %335 = vector.shape_cast %326 : vector<4x1xi1> to vector<4x1xi1>
    %336 = vector.broadcast %335 : vector<4x1xi1> to vector<4x32xi1>
    %337 = arith.select %336, %324, %284 : vector<4x32xi1>, vector<4x32xf32>
    %c6_i32 = arith.constant 6 : i32
    %c7_i32_122 = arith.constant 7 : i32
    %338 = arith.muli %arg0, %c7_i32_122 : i32
    %c2_i32_123 = arith.constant 2 : i32
    %339 = arith.muli %c2_i32_123, %arg0 : i32
    %c1_i32_124 = arith.constant 1 : i32
    %340 = arith.subi %c1_i32_124, %339 : i32
    %341 = arith.muli %340, %c6_i32 : i32
    %342 = arith.addi %338, %341 : i32
    %343 = arith.addi %17, %342 : i32
    %c0_125 = arith.constant 0 : index
    %344 = arith.index_cast %342 : i32 to index
    %c0_126 = arith.constant 0 : index
    %c0_127 = arith.constant 0 : index
    %c0_128 = arith.constant 0 : index
    %345 = vector.load %arg3[%c0_125, %344, %c0_126, %c0_127, %c0_128] : memref<1x8x3x4x32xf32, #tpu.memory_space<vmem>>, vector<1x1x3x4x32xf32>
    %346 = vector.shape_cast %345 : vector<1x1x3x4x32xf32> to vector<3x4x32xf32>
    %cst_129 = arith.constant dense<0.000000e+00> : vector<4x32xf32>
    %347 = tpu.matmul %337, %4, %cst_129 {dimension_numbers = #tpu.dot_dimension_numbers<[1], [0], [0], [1], [0, 0, 1, 1], [], []>} : vector<4x32xf32>, vector<32x32xf32>, vector<4x32xf32> -> vector<4x32xf32>
    %cst_130 = arith.constant dense<0.000000e+00> : vector<4x32xf32>
    %348 = tpu.matmul %337, %6, %cst_130 {dimension_numbers = #tpu.dot_dimension_numbers<[1], [0], [0], [1], [0, 0, 1, 1], [], []>} : vector<4x32xf32>, vector<32x32xf32>, vector<4x32xf32> -> vector<4x32xf32>
    %cst_131 = arith.constant dense<0.000000e+00> : vector<4x32xf32>
    %349 = tpu.matmul %337, %8, %cst_131 {dimension_numbers = #tpu.dot_dimension_numbers<[1], [0], [0], [1], [0, 0, 1, 1], [], []>} : vector<4x32xf32>, vector<32x32xf32>, vector<4x32xf32> -> vector<4x32xf32>
    %350 = vector.broadcast %10 : vector<1x32xf32> to vector<4x32xf32>
    %351 = arith.addf %349, %350 : vector<4x32xf32>
    %352 = vector.extract_strided_slice %346 {offsets = [0, 0, 0], sizes = [1, 4, 32], strides = [1, 1, 1]} : vector<3x4x32xf32> to vector<1x4x32xf32>
    %353 = vector.shape_cast %352 : vector<1x4x32xf32> to vector<4x32xf32>
    %354 = arith.addf %353, %347 : vector<4x32xf32>
    %355 = arith.negf %354 : vector<4x32xf32>
    %356 = math.exp %355 : vector<4x32xf32>
    %cst_132 = arith.constant 1.000000e+00 : f32
    %357 = vector.broadcast %cst_132 : f32 to vector<4x32xf32>
    %358 = arith.addf %357, %356 : vector<4x32xf32>
    %359 = arith.divf %357, %358 : vector<4x32xf32>
    %360 = vector.extract_strided_slice %346 {offsets = [1, 0, 0], sizes = [1, 4, 32], strides = [1, 1, 1]} : vector<3x4x32xf32> to vector<1x4x32xf32>
    %361 = vector.shape_cast %360 : vector<1x4x32xf32> to vector<4x32xf32>
    %362 = arith.addf %361, %348 : vector<4x32xf32>
    %363 = arith.negf %362 : vector<4x32xf32>
    %364 = math.exp %363 : vector<4x32xf32>
    %cst_133 = arith.constant 1.000000e+00 : f32
    %365 = vector.broadcast %cst_133 : f32 to vector<4x32xf32>
    %366 = arith.addf %365, %364 : vector<4x32xf32>
    %367 = arith.divf %365, %366 : vector<4x32xf32>
    %368 = vector.extract_strided_slice %346 {offsets = [2, 0, 0], sizes = [1, 4, 32], strides = [1, 1, 1]} : vector<3x4x32xf32> to vector<1x4x32xf32>
    %369 = vector.shape_cast %368 : vector<1x4x32xf32> to vector<4x32xf32>
    %370 = arith.mulf %359, %351 : vector<4x32xf32>
    %371 = arith.addf %369, %370 : vector<4x32xf32>
    %372 = math.tanh %371 : vector<4x32xf32>
    %cst_134 = arith.constant 1.000000e+00 : f32
    %373 = vector.broadcast %cst_134 : f32 to vector<4x32xf32>
    %374 = arith.subf %373, %367 : vector<4x32xf32>
    %375 = arith.mulf %374, %372 : vector<4x32xf32>
    %376 = arith.mulf %367, %337 : vector<4x32xf32>
    %377 = arith.addf %375, %376 : vector<4x32xf32>
    %378 = vector.broadcast %343 : i32 to vector<4x1xi32>
    %379 = arith.cmpi slt, %378, %11 : vector<4x1xi32>
    %cst_135 = arith.constant 0.000000e+00 : f32
    %380 = vector.shape_cast %379 : vector<4x1xi1> to vector<4x1xi1>
    %381 = vector.broadcast %380 : vector<4x1xi1> to vector<4x32xi1>
    %382 = vector.broadcast %cst_135 : f32 to vector<4x32xf32>
    %383 = arith.select %381, %377, %382 : vector<4x32xi1>, vector<4x32xf32>
    %c0_136 = arith.constant 0 : index
    %384 = arith.index_cast %342 : i32 to index
    %c0_137 = arith.constant 0 : index
    %c0_138 = arith.constant 0 : index
    %385 = vector.load %arg6[%c0_136, %384, %c0_137, %c0_138] : memref<1x8x4x32xf32, #tpu.memory_space<vmem>>, vector<1x1x4x32xf32>
    %386 = vector.shape_cast %385 : vector<1x1x4x32xf32> to vector<4x32xf32>
    %387 = vector.shape_cast %383 : vector<4x32xf32> to vector<1x1x4x32xf32>
    tpu.vector_store %arg6[%c0_136, %384, %c0_137, %c0_138], %387 {strides = array<i32>} : memref<1x8x4x32xf32, #tpu.memory_space<vmem>>, vector<1x1x4x32xf32>,
    %388 = vector.shape_cast %379 : vector<4x1xi1> to vector<4x1xi1>
    %389 = vector.broadcast %388 : vector<4x1xi1> to vector<4x32xi1>
    %390 = arith.select %389, %377, %337 : vector<4x32xi1>, vector<4x32xf32>
    %c7_i32_139 = arith.constant 7 : i32
    %c7_i32_140 = arith.constant 7 : i32
    %391 = arith.muli %arg0, %c7_i32_140 : i32
    %c2_i32_141 = arith.constant 2 : i32
    %392 = arith.muli %c2_i32_141, %arg0 : i32
    %c1_i32_142 = arith.constant 1 : i32
    %393 = arith.subi %c1_i32_142, %392 : i32
    %394 = arith.muli %393, %c7_i32_139 : i32
    %395 = arith.addi %391, %394 : i32
    %396 = arith.addi %17, %395 : i32
    %c0_143 = arith.constant 0 : index
    %397 = arith.index_cast %395 : i32 to index
    %c0_144 = arith.constant 0 : index
    %c0_145 = arith.constant 0 : index
    %c0_146 = arith.constant 0 : index
    %398 = vector.load %arg3[%c0_143, %397, %c0_144, %c0_145, %c0_146] : memref<1x8x3x4x32xf32, #tpu.memory_space<vmem>>, vector<1x1x3x4x32xf32>
    %399 = vector.shape_cast %398 : vector<1x1x3x4x32xf32> to vector<3x4x32xf32>
    %cst_147 = arith.constant dense<0.000000e+00> : vector<4x32xf32>
    %400 = tpu.matmul %390, %4, %cst_147 {dimension_numbers = #tpu.dot_dimension_numbers<[1], [0], [0], [1], [0, 0, 1, 1], [], []>} : vector<4x32xf32>, vector<32x32xf32>, vector<4x32xf32> -> vector<4x32xf32>
    %cst_148 = arith.constant dense<0.000000e+00> : vector<4x32xf32>
    %401 = tpu.matmul %390, %6, %cst_148 {dimension_numbers = #tpu.dot_dimension_numbers<[1], [0], [0], [1], [0, 0, 1, 1], [], []>} : vector<4x32xf32>, vector<32x32xf32>, vector<4x32xf32> -> vector<4x32xf32>
    %cst_149 = arith.constant dense<0.000000e+00> : vector<4x32xf32>
    %402 = tpu.matmul %390, %8, %cst_149 {dimension_numbers = #tpu.dot_dimension_numbers<[1], [0], [0], [1], [0, 0, 1, 1], [], []>} : vector<4x32xf32>, vector<32x32xf32>, vector<4x32xf32> -> vector<4x32xf32>
    %403 = vector.broadcast %10 : vector<1x32xf32> to vector<4x32xf32>
    %404 = arith.addf %402, %403 : vector<4x32xf32>
    %405 = vector.extract_strided_slice %399 {offsets = [0, 0, 0], sizes = [1, 4, 32], strides = [1, 1, 1]} : vector<3x4x32xf32> to vector<1x4x32xf32>
    %406 = vector.shape_cast %405 : vector<1x4x32xf32> to vector<4x32xf32>
    %407 = arith.addf %406, %400 : vector<4x32xf32>
    %408 = arith.negf %407 : vector<4x32xf32>
    %409 = math.exp %408 : vector<4x32xf32>
    %cst_150 = arith.constant 1.000000e+00 : f32
    %410 = vector.broadcast %cst_150 : f32 to vector<4x32xf32>
    %411 = arith.addf %410, %409 : vector<4x32xf32>
    %412 = arith.divf %410, %411 : vector<4x32xf32>
    %413 = vector.extract_strided_slice %399 {offsets = [1, 0, 0], sizes = [1, 4, 32], strides = [1, 1, 1]} : vector<3x4x32xf32> to vector<1x4x32xf32>
    %414 = vector.shape_cast %413 : vector<1x4x32xf32> to vector<4x32xf32>
    %415 = arith.addf %414, %401 : vector<4x32xf32>
    %416 = arith.negf %415 : vector<4x32xf32>
    %417 = math.exp %416 : vector<4x32xf32>
    %cst_151 = arith.constant 1.000000e+00 : f32
    %418 = vector.broadcast %cst_151 : f32 to vector<4x32xf32>
    %419 = arith.addf %418, %417 : vector<4x32xf32>
    %420 = arith.divf %418, %419 : vector<4x32xf32>
    %421 = vector.extract_strided_slice %399 {offsets = [2, 0, 0], sizes = [1, 4, 32], strides = [1, 1, 1]} : vector<3x4x32xf32> to vector<1x4x32xf32>
    %422 = vector.shape_cast %421 : vector<1x4x32xf32> to vector<4x32xf32>
    %423 = arith.mulf %412, %404 : vector<4x32xf32>
    %424 = arith.addf %422, %423 : vector<4x32xf32>
    %425 = math.tanh %424 : vector<4x32xf32>
    %cst_152 = arith.constant 1.000000e+00 : f32
    %426 = vector.broadcast %cst_152 : f32 to vector<4x32xf32>
    %427 = arith.subf %426, %420 : vector<4x32xf32>
    %428 = arith.mulf %427, %425 : vector<4x32xf32>
    %429 = arith.mulf %420, %390 : vector<4x32xf32>
    %430 = arith.addf %428, %429 : vector<4x32xf32>
    %431 = vector.broadcast %396 : i32 to vector<4x1xi32>
    %432 = arith.cmpi slt, %431, %11 : vector<4x1xi32>
    %cst_153 = arith.constant 0.000000e+00 : f32
    %433 = vector.shape_cast %432 : vector<4x1xi1> to vector<4x1xi1>
    %434 = vector.broadcast %433 : vector<4x1xi1> to vector<4x32xi1>
    %435 = vector.broadcast %cst_153 : f32 to vector<4x32xf32>
    %436 = arith.select %434, %430, %435 : vector<4x32xi1>, vector<4x32xf32>
    %c0_154 = arith.constant 0 : index
    %437 = arith.index_cast %395 : i32 to index
    %c0_155 = arith.constant 0 : index
    %c0_156 = arith.constant 0 : index
    %438 = vector.load %arg6[%c0_154, %437, %c0_155, %c0_156] : memref<1x8x4x32xf32, #tpu.memory_space<vmem>>, vector<1x1x4x32xf32>
    %439 = vector.shape_cast %438 : vector<1x1x4x32xf32> to vector<4x32xf32>
    %440 = vector.shape_cast %436 : vector<4x32xf32> to vector<1x1x4x32xf32>
    tpu.vector_store %arg6[%c0_154, %437, %c0_155, %c0_156], %440 {strides = array<i32>} : memref<1x8x4x32xf32, #tpu.memory_space<vmem>>, vector<1x1x4x32xf32>,
    %441 = vector.shape_cast %432 : vector<4x1xi1> to vector<4x1xi1>
    %442 = vector.broadcast %441 : vector<4x1xi1> to vector<4x32xi1>
    %443 = arith.select %442, %430, %390 : vector<4x32xi1>, vector<4x32xf32>
    %c8_i32_157 = arith.constant 8 : i32
    %c0_158 = arith.constant 0 : index
    %c0_159 = arith.constant 0 : index
    %c0_160 = arith.constant 0 : index
    %444 = vector.load %arg7[%c0_158, %c0_159, %c0_160] : memref<1x4x32xf32, #tpu.memory_space<vmem>>, vector<1x4x32xf32>
    %445 = vector.shape_cast %444 : vector<1x4x32xf32> to vector<4x32xf32>
    %446 = vector.shape_cast %443 : vector<4x32xf32> to vector<1x4x32xf32>
    tpu.vector_store %arg7[%c0_158, %c0_159, %c0_160], %446 {strides = array<i32>} : memref<1x4x32xf32, #tpu.memory_space<vmem>>, vector<1x4x32xf32>,
    return
  }
  func.func @transform_0(%arg0: i32, %arg1: i32) -> (i32, i32) {
    %c0_i32 = arith.constant 0 : i32
    %c0_i32_0 = arith.constant 0 : i32
    %c0_i32_1 = arith.constant 0 : i32
    return %c0_i32, %c0_i32_0 : i32, i32
  }
  func.func @transform_1(%arg0: i32, %arg1: i32) -> (i32, i32, i32, i32, i32) {
    %c0_i32 = arith.constant 0 : i32
    %0 = arith.muli %arg0, %c0_i32 : i32
    %c2_i32 = arith.constant 2 : i32
    %1 = arith.muli %c2_i32, %arg0 : i32
    %c1_i32 = arith.constant 1 : i32
    %2 = arith.subi %c1_i32, %1 : i32
    %3 = arith.muli %2, %arg1 : i32
    %4 = arith.addi %0, %3 : i32
    %c0_i32_0 = arith.constant 0 : i32
    %c0_i32_1 = arith.constant 0 : i32
    %c0_i32_2 = arith.constant 0 : i32
    %c0_i32_3 = arith.constant 0 : i32
    return %arg0, %4, %c0_i32_0, %c0_i32_1, %c0_i32_2 : i32, i32, i32, i32, i32
  }
  func.func @transform_2(%arg0: i32, %arg1: i32) -> (i32, i32, i32, i32) {
    %c0_i32 = arith.constant 0 : i32
    %c0_i32_0 = arith.constant 0 : i32
    %c0_i32_1 = arith.constant 0 : i32
    %c0_i32_2 = arith.constant 0 : i32
    return %arg0, %c0_i32, %c0_i32_0, %c0_i32_1 : i32, i32, i32, i32
  }
  func.func @transform_3(%arg0: i32, %arg1: i32) -> (i32, i32, i32) {
    %c0_i32 = arith.constant 0 : i32
    %c0_i32_0 = arith.constant 0 : i32
    %c0_i32_1 = arith.constant 0 : i32
    return %arg0, %c0_i32, %c0_i32_0 : i32, i32, i32
  }
  func.func @transform_4(%arg0: i32, %arg1: i32) -> (i32, i32, i32, i32) {
    %c0_i32 = arith.constant 0 : i32
    %0 = arith.muli %arg0, %c0_i32 : i32
    %c2_i32 = arith.constant 2 : i32
    %1 = arith.muli %c2_i32, %arg0 : i32
    %c1_i32 = arith.constant 1 : i32
    %2 = arith.subi %c1_i32, %1 : i32
    %3 = arith.muli %2, %arg1 : i32
    %4 = arith.addi %0, %3 : i32
    %c0_i32_0 = arith.constant 0 : i32
    %c0_i32_1 = arith.constant 0 : i32
    %c0_i32_2 = arith.constant 0 : i32
    return %arg0, %4, %c0_i32_0, %c0_i32_1 : i32, i32, i32, i32
  }
  func.func @transform_5(%arg0: i32, %arg1: i32) -> (i32, i32, i32) {
    %c0_i32 = arith.constant 0 : i32
    %c0_i32_0 = arith.constant 0 : i32
    %c0_i32_1 = arith.constant 0 : i32
    return %arg0, %c0_i32, %c0_i32_0 : i32, i32, i32
  }
}

</mosaic_0001>

<bundles_post_ra>
// kernel: tpu_custom_call.1
= control target key start
LH: loop header
LB: loop body
LE: loop exit
PB: predicated region body
PF: predicated region fallthrough
CT: control target
= control target key end

     0   :  { %s4285_s0 = inlined_call_operand.vmem [shape: s32[4,1], index: 0, kind: input, shape index: {}]   ;;  %s4286_s1 = inlined_call_operand.hbm [shape: f32[2,8,3,4,32], index: 1, kind: input, shape index: {}]   ;;  %s4287_s2 = inlined_call_operand.hbm [shape: f32[2,3,32,32], index: 2, kind: input, shape index: {}]   ;;  %s4288_s3 = inlined_call_operand.vmem [shape: f32[2,1,32], index: 3, kind: input, shape index: {}]   ;;  %s4289_s4 = inlined_call_operand.hbm [shape: f32[2,8,4,32], index: 4, kind: output, shape index: {0}]   ;;  %s4290_s5 = inlined_call_operand.hbm [shape: f32[2,4,32], index: 5, kind: output, shape index: {1}]  }
   0x1   :  { %4293 = sst [smem:[#allocation14_spill]] %s4286_s1 }
   0x2   :  { %11 = vsyncpa [#allocation3], 0 }
   0x3   :  { %13 = vsyncpa [#allocation3 + $0x1], 0 }
   0x4   :  { %14 = vsyncpa [#allocation6], 0 }
   0x5   :  { %16 = vsyncpa [#allocation6 + $0x1], 0 }
   0x6   :  { %17 = vsyncpa [#allocation4], 0 }
   0x7   :  { %19 = vsyncpa [#allocation4 + $0x1], 0 }
   0x8   :  { %20 = vsyncpa [#allocation9], 0 }
   0x9   :  { %22 = vsyncpa [#allocation9 + $0x1], 0  ;;  %s3681_s18 = smov 0   ;;  %s3683_s19 = smov 0  }
   0xa   :  { %s3685_s20 = smov 0   ;;  %s3687_s21 = smov 0  }
   0xb   :  { %s3689_s22 = smov 0   ;;  %s3691_s23 = smov 0  }
   0xc LB: > { %s2676_s24 = sadd.s32 4294967295, %s3635_s23   ;;  %s2677_s25 = sadd.s32 4294967294, %s3635_s23   ;;  %s3635_s23 = sphi %s3691_s23, %s28_s23   ;;  %s3631_s22 = sphi %s3689_s22, %s4310_s22   ;;  %s3627_s21 = sphi %s3687_s21, %s4309_s21   ;;  %s3623_s20 = sphi %s3685_s20, %s4308_s20   ;;  %s3619_s19 = sphi %s3683_s19, %s4307_s19   ;;  %s3615_s18 = sphi %s3681_s18, %s4306_s18  }
   0xd   : > { %s40_s26 = sadd.s32 1, %s3631_s22  ;;  %s76_s27 = sadd.s32 1, %s3623_s20 }
   0xe   : > { %p42_p0 = scmp.ge.s32.totalorder %s40_s26, 2  ;;  %p83_p1 = scmp.ne.s32.totalorder %s3623_s20, %s3619_s19 }
   0xf   : > { %p84_p2 = scmp.eq.s32.totalorder %s3635_s23, 0  ;;  %p89_p3 = scmp.ne.s32.totalorder %s3619_s19, %s3615_s18 }
  0x10   : > { %s4312_s26 = smov (%p42_p0, %s40_s26), 0  ;;  %p90_p5 = scmp.eq.s32.totalorder %s2676_s24, 0 }
  0x11   : > { %p3722_p4 = por %p84_p2, %p83_p1  ;;  %s71_s29 = ssub.s32 %s3631_s22, %s4312_s26 }
  0x12   : > { %p173_p6 = scmp.eq.s32.totalorder %s2676_s24, 1  ;;  %p74_p7 = scmp.eq.s32.totalorder %s71_s29, 0 }
  0x13   : > { %p3728_p8 = por %p90_p5, %p89_p3  ;;  %p179_p10 = scmp.eq.s32.totalorder %s2677_s25, 1 }
  0x14   : > { %p3732_p9 = por %p173_p6, %p83_p1  ;;  %p3315_p13 = scmp.lt.s32.totalorder %s3635_s23, 2 }
  0x15   : > { %s4295_s30 = scalar_select %p3728_p8, 1, 0 }
  0x16   : > { %s4296_s6 = scalar_select %p3732_p9, 1, 0 }
  0x17   : > { %s3737_s7 = scalar_select %p74_p7, %s3623_s20, %s76_s27  }
  0x18   : > { %p3739_p11 = por %p179_p10, %p89_p3  ;;  %s3746_s9 = sand.u32 1, %s3623_s20  }
  0x19   : > { %s3288_s10 = smul.u32 96, %s3746_s9  ;;  %p3752_p0 = pnand %p3315_p13, %p3722_p4 }
  0x1a   : > { %s4297_s8 = scalar_select %p3739_p11, 1, 0 }
  0x1b   : > { %s3289_s11 = smul.u32 1536, %s3631_s22  ;;  %s4299_s1 = sld [smem:[#allocation14_spill]] }
  0x1c   : > { %s232_s16 = scalar_lea.vmem [#allocation2], %s3288_s10  ;;  %s229_s24 = scalar_lea.sflag [#allocation3], %s3746_s9 }
  0x1d   : > { %s245_s17 = sshll.u32 %s232_s16, 4  ;;  %p3459_p3 = pneg %p3752_p0  ;;  %s3765_s17 = int_to_ptr.vmem [resolvable:$true] %s245_s17 }
  0x21   : > { %s3761_s15 = scalar_lea.hbm %s4299_s1, %s3289_s11  ;;  %s3462_s29 = scalar_lea.hbm %s4299_s1, 3072 }
  0x22   : > { %s3457_s25 = scalar_lea.hbm %s3761_s15, 1536  ;;  %p3463_p6 = scmp.lt.u32.totalorder %s3761_s15, %s4299_s1 }
  0x23   : > { %p3458_p2 = scmp.ne.s32.totalorder %s3761_s15, %s3457_s25  ;;  %p3464_p7 = scmp.lt.u32.totalorder %s3462_s29, %s3457_s25 }
  0x24   : > { %p3466_p13 = scmp.lt.u32.totalorder %s3457_s25, %s3761_s15 }
  0x25   : > { %p3460_p4 = pnand %p3459_p3, %p3458_p2  ;;  %p3465_p10 = por %p3464_p7, %p3463_p6 }
  0x27   : > { %p3461_p5 = pneg %p3460_p4  ;;  %p3467_p12 = por %p3466_p13, %p3465_p10 }
  0x29   : > { %p3468_p1 = pnand %p3467_p12, %p3461_p5 }
  0x2b   : > { %3471 = shalt.err (!%p3468_p1)
}
  0x2c   : > { %s3472_s16 = scalar_lea.vmem %s3765_s17, 1536  ;;  %s3637_s27 = smov [#allocation2]  }
  0x2d   : > { %p3473_p2 = scmp.ne.s32.totalorder %s3765_s17, %s3472_s16  ;;  %s3477_s28 = sshll.u32 %s3637_s27, 4  ;;  %s3478_s28 = int_to_ptr.vmem [resolvable:$false] %s3477_s28 }
  0x2e   : > { %s3479_s13 = scalar_lea.vmem %s3478_s28, 3072  ;;  %p3480_p9 = scmp.lt.s32.totalorder %s3765_s17, %s3478_s28 }
  0x2f   : > { %p3475_p4 = pnand %p3473_p2, %p3459_p3  ;;  %p3481_p6 = scmp.lt.s32.totalorder %s3479_s13, %s3472_s16 }
  0x31   : > { %p3476_p11 = pneg %p3475_p4  ;;  %p3482_p7 = por %p3481_p6, %p3480_p9 }
  0x33   : > { %p3483_p10 = pnand %p3482_p7, %p3476_p11 }
  0x35   : > { %3486 = shalt.err (!%p3483_p10)
}
  0x36   : > { %s3638_s25 = smov 64   ;;  %s3639_s29 = smov 4  }
  0x37   : > { %3304 = dma.hbm_to_vmem [thread:$0]  (!%p3752_p0), %s3761_s15, 1536, %s3765_s17, %s229_s24, %s3638_s25, %s3638_s25, %s3639_s29  }
  0x38   : > { %p280_p12 = scmp.lt.s32.totalorder %s3635_s23, 3  ;;  %s3802_s27 = scalar_lea.hbm %s4287_s2, %s3289_s11 }
  0x39   : > { %p4300_p9 = scmp.ge.s32.totalorder %s3635_s23, 1  ;;  %s259_s13 = scalar_lea.vmem [#allocation5], %s3288_s10 }
  0x3a   : > { %s266_s1 = sshll.u32 %s259_s13, 4  ;;  %s256_s15 = scalar_lea.sflag [#allocation6], %s3746_s9  ;;  %s3812_s1 = int_to_ptr.vmem [resolvable:$true] %s266_s1 }
  0x3b   : > { %p3806_p11 = pnand %p4300_p9, %p280_p12  ;;  %s3487_s17 = scalar_lea.hbm %s3802_s27, 1536 }
  0x3c   : > { %p3488_p1 = scmp.ne.s32.totalorder %s3802_s27, %s3487_s17  ;;  %s3492_s25 = scalar_lea.hbm %s4287_s2, 3072 }
  0x3d   : > { %p3493_p2 = scmp.lt.u32.totalorder %s3802_s27, %s4287_s2  ;;  %p3494_p4 = scmp.lt.u32.totalorder %s3492_s25, %s3487_s17 }
  0x3e   : > { %p3490_p5 = pnand %p3488_p1, %p3459_p3  ;;  %p3496_p7 = scmp.lt.u32.totalorder %s3487_s17, %s3802_s27 }
  0x3f   : > { %p3495_p6 = por %p3494_p4, %p3493_p2 }
  0x40   : > { %p3491_p13 = pneg %p3490_p5 }
  0x41   : > { %p3497_p10 = por %p3496_p7, %p3495_p6 }
  0x43   : > { %p3498_p12 = pnand %p3497_p10, %p3491_p13 }
  0x45   : > { %3501 = shalt.err (!%p3498_p12)
}
  0x46   : > { %s3502_s10 = scalar_lea.vmem %s3812_s1, 1536  ;;  %s3640_s16 = smov [#allocation5]  }
  0x47   : > { %p3503_p9 = scmp.ne.s32.totalorder %s3812_s1, %s3502_s10  ;;  %s3507_s13 = sshll.u32 %s3640_s16, 4  ;;  %s3508_s13 = int_to_ptr.vmem [resolvable:$false] %s3507_s13 }
  0x48   : > { %s3509_s11 = scalar_lea.vmem %s3508_s13, 3072  ;;  %p3510_p8 = scmp.lt.s32.totalorder %s3812_s1, %s3508_s13 }
  0x49   : > { %p3505_p1 = pnand %p3503_p9, %p3459_p3  ;;  %p3511_p2 = scmp.lt.s32.totalorder %s3509_s11, %s3502_s10 }
  0x4b   : > { %p3506_p5 = pneg %p3505_p1  ;;  %p3512_p4 = por %p3511_p2, %p3510_p8 }
  0x4d   : > { %p3513_p6 = pnand %p3512_p4, %p3506_p5 }
  0x4f   : > { %3516 = shalt.err (!%p3513_p6)
}
  0x50   : > { %s3641_s17 = smov 128   ;;  %s3642_s24 = smov 8  }
  0x51   : > { %3307 = dma.hbm_to_vmem [thread:$0]  (!%p3752_p0), %s3802_s27, 1536, %s3812_s1, %s256_s15, %s3641_s17, %s3641_s17, %s3642_s24  }
  0x52   : > { %284 = sbr.rel (%p3806_p11) target bundleno = 2221 (0x8ad), region = 36  ;;  %s3843_s25 = sand.u32 (!%p3806_p11), 1, %s3619_s19  }
  0x53   : > { %s3292_s29 = smul.u32 (!%p3806_p11), 96, %s3843_s25  ;;  %s287_s14 = scalar_lea.sflag (!%p3806_p11), [#allocation3], %s3843_s25 }
  0x54   : > { %p4302_p8 = scmp.ne.s32.totalorder (!%p3806_p11), %s4295_s30, 0 }
  0x55   : > { %s3847_s10 = scalar_lea.vmem (!%p3806_p11), [#allocation2], %s3292_s29 }
  0x59   : > { %3598 = dma.done.wait (%p4302_p8), %s287_s14, 1536  }
  0x5a   : > { %3600 = vsyncadd (%p4302_p8), %s287_s14, 4294965760  ;;  %s296_s1 = scalar_lea.sflag [#allocation6], %s3843_s25  ;;  %s3854_s9 = scalar_lea.vmem [#allocation5], %s3292_s29 }
  0x5b   : > { %3602 = dma.done.wait (%p4302_p8), %s296_s1, 1536  }
  0x5c   : > { %3604 = vsyncadd (%p4302_p8), %s296_s1, 4294965760  ;;  %s2689_s12 = sshll.u32 %s3843_s25, 2  ;;  %vm354_vm0 = vcmask 257024   ;;  %v3643_v0 = vmov 0.0|0.0   ;;  %vm3644_vm1 = vmmov 0   ;;  %v3645_v1 = vmov 0.0  }
  0x5d   : > { %3144 = vmatprep.subr.bf16.mxu0 %v3643_v0  ;;  %2888 = vmatprep.mubr.msk.f32.mxu0 %vm3644_vm1, %v3645_v1  ;;  %s3864_s30 = scalar_lea.vmem [#allocation8], %s2689_s12  ;;  %s2698_s27 = sshll.u32 %s3627_s21, 1  ;;  %v3646_v2 = vmov 0   ;;  %v356_v3 = vld [vmem:[%s3854_s9] sm:$0xff]  ;;  %v357_v4 = vld [vmem:[%s3854_s9 + $0x8] sm:$0xff]  ;;  %v358_v5 = vld [vmem:[%s3854_s9 + $0x10] sm:$0xff] }
  0x5e   : > { %355 = vst.msk [vmem:[%s3864_s30] sm:$0xf] %vm354_vm0, %v3645_v1  ;;  %3150 = vmatprep.subr.bf16.mxu1 %v3643_v0  ;;  %2899 = vmatprep.mubr.msk.f32.mxu1 %vm3644_vm1, %v3645_v1  ;;  %s3876_s28 = smul.u32 7, %s3627_s21  ;;  %s3878_s15 = ssub.s32 1, %s2698_s27  ;;  %v3883_v6 = vpack.c.bf16 %v357_v4, %v356_v3  ;;  %v359_v7 = vld [vmem:[%s3854_s9 + $0x18] sm:$0xff]  ;;  %v2690_v8 = vld [vmem:[%s3854_s9 + $0x20] sm:$0xff] }
  0x5f   : > { %3375 = vset.pattern.permute.xlu0 %v3646_v2  ;;  %3376 = vset.pattern.permute.xlu1 %v3646_v2  ;;  %v2691_v9 = vld [vmem:[%s3854_s9 + $0x28] sm:$0xff]  ;;  %v2692_v11 = vld [vmem:[%s3854_s9 + $0x30] sm:$0xff]  ;;  %v2693_v12 = vld [vmem:[%s3854_s9 + $0x38] sm:$0xff]  ;;  %s2726_s13 = sshll.u32 %s3878_s15, 2  ;;  %v3899_v14 = vpack.c.bf16 %v359_v7, %v358_v5  ;;  %s1907_s29 = smul.u32 6, %s3878_s15  ;;  %vm384_vm3 = vcmask 261120  }
  0x60   : > { %s3890_s16 = sadd.s32 %s3876_s28, %s3878_s15  ;;  %v3892_v10 = vpack.c.bf16 %v2691_v9, %v2690_v8  ;;  %v625_v13 = vstv %s3876_s28  ;;  %3146 = vmatpush3.bf16.msra.mxu0 %v3883_v6  ;;  %v3903_v15 = vpack.c.bf16 %v2693_v12, %v2692_v11  ;;  %v2694_v16 = vld [vmem:[%s3854_s9 + $0x40] sm:$0xff]  ;;  %v2695_v17 = vld [vmem:[%s3854_s9 + $0x48] sm:$0xff]  ;;  %v3910_v18 = vld [vmem:[%s4285_s0] sm:$0xf]  ;;  %s3916_s24 = sadd.s32 %s2726_s13, %s3876_s28 }
  0x61   : > { %3147 = vmatprep.subr.bf16.mxu0 %v3643_v0  ;;  %v879_v19 = vstv %s3890_s16  ;;  %vm626_vm2 = vcmp.lt.s32.totalorder %v625_v13, %v3910_v18  ;;  %v3924_v22 = vpack.c.bf16 %v2695_v17, %v2694_v16  ;;  %v2696_v23 = vld [vmem:[%s3854_s9 + $0x50] sm:$0xff]  ;;  %v2697_v24 = vld [vmem:[%s3854_s9 + $0x58] sm:$0xff]  ;;  %v1641_v25 = vstv %s3916_s24  ;;  %s3933_s14 = sadd.s32 %s1907_s29, %s3876_s28  ;;  %s2699_s1 = smul.u32 84, %s3627_s21 }
  0x62   : > { %3152 = vmatpush3.bf16.msra.mxu1 %v3892_v10  ;;  %v627_v20 = vsel %vm626_vm2, 1, %v3646_v2  ;;  %vm880_vm4 = vcmp.lt.s32.totalorder %v879_v19, %v3910_v18  ;;  %v3942_v27 = vpack.c.bf16 %v2697_v24, %v2696_v23  ;;  %vm1642_vm5 = vcmp.lt.s32.totalorder %v1641_v25, %v3910_v18  ;;  %p343_p0 = scmp.lt.s32.totalorder %s3627_s21, 1  ;;  %s2688_s17 = sshll.u32 %s3843_s25, 5 }
  0x63   : > { %3153 = vmatprep.subr.bf16.mxu1 %v3643_v0  ;;  %629 = vperm.xlu0 %3375, %v627_v20   ;;  %v881_v26 = vsel %vm880_vm4, 1, %v3646_v2  ;;  %v2149_v28 = vstv %s3933_s14  ;;  %v1643_v29 = vsel %vm1642_vm5, 1, %v3646_v2  ;;  %s380_s9 = scalar_lea.vmem %s3847_s10, %s2699_s1 [#allocation2]  ;;  %s2706_s29 = smul.u32 28, %s3627_s21 }
  0x64   : > { %3149 = vmatpush3.bf16.msra.mxu0 %v3899_v14  ;;  %vm2150_vm6 = vcmp.lt.s32.totalorder %v2149_v28, %v3910_v18  ;;  %v381_v31 = vld [vmem:[%s380_s9] sm:$0xf]  ;;  %v382_v32 = vld [vmem:[%s380_s9 + $0x4] sm:$0xf]  ;;  %s344_s12 = scalar_select %p343_p0, %s3627_s21, 1 }
  0x65   : > { %v3922_v21 = vld [vmem:[%s3864_s30] sm:$0xf]  ;;  %3156 = vmatprep.subr.bf16.mxu0 %v3643_v0  ;;  %v2151_v30 = vsel %vm2150_vm6, 1, %v3646_v2  ;;  %v383_v50 = vld [vmem:[%s380_s9 + $0x8] sm:$0xf]  ;;  %s3981_s1 = scalar_lea.vmem [#allocation7], %s2688_s17 }
  0x66   : > { %3155 = vmatpush3.bf16.msra.mxu1 %v3903_v15  ;;  %s345_s11 = scalar_lea.vmem %s4288_s3, %s344_s12  ;;  %s634_s12 = scalar_lea.vmem %s3981_s1, %s2706_s29 [#allocation7] }
  0x67   : > { %3162 = vmatprep.subr.bf16.mxu1 %v3643_v0  ;;  %2889 = vmatmul.mubr.msk.f32.vlgmr.msra.gmra.mrb[0].mxu0 %vm384_vm3, %v3922_v21  ;;  %v3975_v46 = vld [vmem:[%s345_s11] ss:$0 sm:$0xff]  ;;  %s2713_s9 = sshll.u32 %s3878_s15, 1  ;;  %s1145_s27 = smul.u32 3, %s3878_s15 }
  0x68   : > { %3158 = vmatpush3.bf16.msra.mxu0 %v3924_v22  ;;  %2910 = vmatprep.mubr.msk.f32.mxu0 %vm3644_vm1, %v3645_v1  ;;  %s4015_s13 = sadd.s32 %s2713_s9, %s3876_s28  ;;  %s1653_s11 = smul.u32 5, %s3878_s15 }
  0x69   : > { %2900 = vmatmul.mubr.msk.f32.vlgmr.msra.gmra.mrb[0].mxu1 %vm384_vm3, %v3922_v21  ;;  %3159 = vmatprep.subr.bf16.mxu0 %v3643_v0  ;;  %v1133_v62 = vstv %s4015_s13  ;;  %s4020_s17 = sadd.s32 %s1145_s27, %s3876_s28  ;;  %s640_s27 = smul.u32 12, %s3890_s16 }
  0x6a   : > { %883 = vperm.xlu0 %3375, %v881_v26   ;;  %3164 = vmatpush3.bf16.msra.mxu1 %v3883_v6  ;;  %vm1134_vm8 = vcmp.lt.s32.totalorder %v1133_v62, %v3910_v18  ;;  %v1387_v63 = vstv %s4020_s17  ;;  %s4027_s29 = sadd.s32 %s1653_s11, %s3876_s28  ;;  %p4303_p11 = scmp.ne.s32.totalorder %s4296_s6, 0 }
  0x6b   : > { %3165 = vmatprep.subr.bf16.mxu1 %v3643_v0  ;;  %2921 = vmatprep.mubr.msk.f32.mxu1 %vm3644_vm1, %v3645_v1  ;;  %v1135_v3 = vsel %vm1134_vm8, 1, %v3646_v2  ;;  %vm1388_vm9 = vcmp.lt.s32.totalorder %v1387_v63, %v3910_v18  ;;  %v1895_v4 = vstv %s4027_s29  ;;  %s641_s11 = scalar_lea.vmem %s3847_s10, %s640_s27 [#allocation2]  ;;  %s2719_s27 = sshll.u32 %s4015_s13, 2 }
  0x6c   : > { %3161 = vmatpush3.bf16.msra.mxu0 %v3942_v27  ;;  %1137 = vperm.xlu1 %3376, %v1135_v3   ;;  %v1389_v5 = vsel %vm1388_vm9, 1, %v3646_v2  ;;  %vm1896_vm10 = vcmp.lt.s32.totalorder %v1895_v4, %v3910_v18  ;;  %v642_v11 = vld [vmem:[%s641_s11] sm:$0xf]  ;;  %v643_v17 = vld [vmem:[%s641_s11 + $0x4] sm:$0xf] }
  0x6d   : > { %3168 = vmatprep.subr.bf16.mxu0 %v3643_v0  ;;  %v1897_v8 = vsel %vm1896_vm10, 1, %v3646_v2 }
  0x6e   : > { %1645 = vperm.xlu0 %3375, %v1643_v29   ;;  %3167 = vmatpush3.bf16.msra.mxu1 %v3899_v14 }
  0x6f   : > { %2911 = vmatmul.mubr.msk.f32.vlgmr.msra.gmra.mrb[2].mxu0 %vm384_vm3, %v3922_v21  ;;  %3174 = vmatprep.subr.bf16.mxu1 %v3643_v0 }
  0x70   : > { %3170 = vmatpush3.bf16.msra.mxu0 %v3892_v10  ;;  %2932 = vmatprep.mubr.msk.f32.mxu0 %vm3644_vm1, %v3645_v1 }
  0x71   : > { %3171 = vmatprep.subr.bf16.mxu0 %v3643_v0  ;;  %1391 = vperm.xlu1 %3376, %v1389_v5  }
  0x72   : > { %2153 = vperm.xlu0 %3375, %v2151_v30  }
  0x74   : > { %3173 = vmatpush3.bf16.msra.mxu0 %v3903_v15 }
  0x75   : > { %3180 = vmatprep.subr.bf16.mxu0 %v3643_v0  ;;  %1899 = vperm.xlu1 %3376, %v1897_v8  }
  0xe2   : > { %v630_v56 = vpop.permute.xlu0 %629 }
  0xe3   : > { %vm631_vm7 = vcmp.eq.s32.totalorder %v630_v56, 1 }
 0x13a   : > { %v454_v33 = vpop.f32.mrb[0].mxu0 }
 0x13b   : > { %v604_v34 = vadd.f32 %v454_v33, %v381_v31  ;;  %v2890_v35 = vpop.f32.mrb[1].mxu0 }
 0x13c   : > { %v524_v36 = vpop.f32.mrb[0].mxu1 }
 0x13d   : > { %v611_v37 = vadd.f32 %v524_v36, %v382_v32  ;;  %v2901_v38 = vpop.f32.mrb[1].mxu1  ;;  %v2704_v39 = vmul.f32 -1.442695, %v604_v34  ;;  %v644_v32 = vld [vmem:[%s641_s11 + $0x8] sm:$0xf]  ;;  %s1142_s11 = scalar_lea.vmem %s3981_s1, %s2719_s27 [#allocation7]  ;;  %s2732_s27 = sshll.u32 %s3916_s24, 2 }
 0x13f   : > { %3377 = vpow2.f32 %v2704_v39  ;;  %v2705_v40 = vmul.f32 -1.442695, %v611_v37 }
 0x141   : > { %3379 = vpow2.f32 %v2705_v40  ;;  %v884_v40 = vpop.permute.xlu0 %883 }
 0x142   : > { %v600_v41 = vpop.f32.mrb[2].mxu0  ;;  %vm885_vm12 = vcmp.eq.s32.totalorder %v884_v40, 1 }
 0x143   : > { %v2912_v42 = vpop.f32.mrb[3].mxu0  ;;  %v601_v48 = vadd.f32 %v3975_v46, %v600_v41 }
 0x149   : > { %v3378_v43 = vpop.eup %3377 }
 0x14a   : > { %v608_v44 = vadd.f32 1.0, %v3378_v43 }
 0x14b   : > { %v3380_v45 = vpop.eup %3379 }
 0x14c   : > { %3381 = vrcp.f32 %v608_v44  ;;  %v615_v47 = vadd.f32 1.0, %v3380_v45 }
 0x14e   : > { %3383 = vrcp.f32 %v615_v47 }
 0x156   : > { %v3382_v49 = vpop.eup %3381 }
 0x157   : > { %v618_v51 = vmul.f32 %v3382_v49, %v601_v48 }
 0x158   : > { %v3384_v53 = vpop.eup %3383 }
 0x159   : > { %v619_v52 = vadd.f32 %v618_v51, %v383_v50  ;;  %v621_v54 = vsub.f32 1.0, %v3384_v53  ;;  %v623_v58 = vmul.f32 %v3384_v53, %v3922_v21 }
 0x15b   : > { %3385 = vtanh.f32 %v619_v52 }
 0x165   : > { %v3386_v55 = vpop.eup %3385 }
 0x166   : > { %v622_v57 = vmul.f32 %v3386_v55, %v621_v54 }
 0x168   : > { %v624_v59 = vadd.f32 %v623_v58, %v622_v57 }
 0x16a   : > { %v632_v60 = vsel %vm631_vm7, %v624_v59, 0.0  ;;  %v3985_v61 = vsel %vm631_vm7, %v624_v59, %v3922_v21 }
 0x16b   : > { %636 = vst.msk [vmem:[%s634_s12] sm:$0xf] %vm354_vm0, %v632_v60  ;;  %2922 = vmatmul.mubr.msk.f32.vlgmr.msra.gmra.mrb[2].mxu1 %vm384_vm3, %v3985_v61  ;;  %2933 = vmatmul.mubr.msk.f32.vlgmr.msra.gmra.mrb[4].mxu0 %vm384_vm3, %v3985_v61  ;;  %s2161_s12 = smul.u32 7, %s3878_s15 }
 0x16c   : > { %3176 = vmatpush3.bf16.msra.mxu1 %v3924_v22  ;;  %2943 = vmatprep.mubr.msk.f32.mxu1 %vm3644_vm1, %v3645_v1 }
 0x16d   : > { %3177 = vmatprep.subr.bf16.mxu1 %v3643_v0  ;;  %3182 = vmatpush3.bf16.msra.mxu0 %v3883_v6  ;;  %s4034_s9 = sadd.s32 %s2161_s12, %s3876_s28  ;;  %s2712_s28 = sshll.u32 %s3890_s16, 2 }
 0x16e   : > { %3183 = vmatprep.subr.bf16.mxu0 %v3643_v0  ;;  %2954 = vmatprep.mubr.msk.f32.mxu0 %vm3644_vm1, %v3645_v1  ;;  %v2403_v7 = vstv %s4034_s9  ;;  %s888_s15 = scalar_lea.vmem %s3981_s1, %s2712_s28 [#allocation7]  ;;  %s894_s16 = smul.u32 12, %s4015_s13 }
 0x16f   : > { %vm2404_vm11 = vcmp.lt.s32.totalorder %v2403_v7, %v3910_v18  ;;  %s1148_s13 = smul.u32 12, %s4020_s17 }
 0x170   : > { %3179 = vmatpush3.bf16.msra.mxu1 %v3942_v27  ;;  %v2405_v9 = vsel %vm2404_vm11, 1, %v3646_v2  ;;  %s895_s12 = scalar_lea.vmem %s3847_s10, %s894_s16 [#allocation2] }
 0x171   : > { %3186 = vmatprep.subr.bf16.mxu1 %v3643_v0  ;;  %3185 = vmatpush3.bf16.msra.mxu0 %v3899_v14  ;;  %v896_v44 = vld [vmem:[%s895_s12] sm:$0xf]  ;;  %v897_v45 = vld [vmem:[%s895_s12 + $0x4] sm:$0xf]  ;;  %v898_v63 = vld [vmem:[%s895_s12 + $0x8] sm:$0xf]  ;;  %s1149_s28 = scalar_lea.vmem %s3847_s10, %s1148_s13 [#allocation2] }
 0x172   : > { %3192 = vmatprep.subr.bf16.mxu0 %v3643_v0  ;;  %2407 = vperm.xlu1 %3376, %v2405_v9   ;;  %v1138_v9 = vpop.permute.xlu1 %1137 }
 0x173   : > { %2944 = vmatmul.mubr.msk.f32.vlgmr.msra.gmra.mrb[4].mxu1 %vm384_vm3, %v3985_v61  ;;  %vm1139_vm13 = vcmp.eq.s32.totalorder %v1138_v9, 1 }
 0x174   : > { %3188 = vmatpush3.bf16.msra.mxu1 %v3892_v10  ;;  %2965 = vmatprep.mubr.msk.f32.mxu1 %vm3644_vm1, %v3645_v1 }
 0x175   : > { %3189 = vmatprep.subr.bf16.mxu1 %v3643_v0 }
 0x178   : > { %3191 = vmatpush3.bf16.msra.mxu1 %v3903_v15 }
 0x179   : > { %3198 = vmatprep.subr.bf16.mxu1 %v3643_v0 }
 0x23e   : > { %v714_v12 = vpop.f32.mrb[2].mxu1  ;;  %v784_v13 = vpop.f32.mrb[4].mxu0 }
 0x23f   : > { %v858_v16 = vadd.f32 %v714_v12, %v642_v11  ;;  %v2923_v19 = vpop.f32.mrb[3].mxu1  ;;  %v2934_v20 = vpop.f32.mrb[5].mxu0  ;;  %v865_v23 = vadd.f32 %v784_v13, %v643_v17 }
 0x240   : > { %v1150_v19 = vld [vmem:[%s1149_s28] sm:$0xf] }
 0x241   : > { %v2710_v21 = vmul.f32 -1.442695, %v858_v16  ;;  %v2711_v24 = vmul.f32 -1.442695, %v865_v23 }
 0x243   : > { %3387 = vpow2.f32 %v2710_v21 }
 0x244   : > { %3389 = vpow2.f32 %v2711_v24  ;;  %v1151_v24 = vld [vmem:[%s1149_s28 + $0x4] sm:$0xf] }
 0x246   : > { %v854_v25 = vpop.f32.mrb[4].mxu1 }
 0x247   : > { %v2945_v26 = vpop.f32.mrb[5].mxu1  ;;  %v855_v30 = vadd.f32 %v3975_v46, %v854_v25 }
 0x24d   : > { %v3388_v18 = vpop.eup %3387 }
 0x24e   : > { %v862_v2 = vadd.f32 1.0, %v3388_v18  ;;  %v3390_v28 = vpop.eup %3389 }
 0x24f   : > { %v869_v29 = vadd.f32 1.0, %v3390_v28 }
 0x250   : > { %3391 = vrcp.f32 %v862_v2 }
 0x251   : > { %3393 = vrcp.f32 %v869_v29 }
 0x25a   : > { %v3392_v31 = vpop.eup %3391 }
 0x25b   : > { %v872_v33 = vmul.f32 %v3392_v31, %v855_v30  ;;  %v3394_v35 = vpop.eup %3393 }
 0x25c   : > { %v875_v36 = vsub.f32 1.0, %v3394_v35  ;;  %v877_v39 = vmul.f32 %v3394_v35, %v3985_v61 }
 0x25d   : > { %v873_v34 = vadd.f32 %v872_v33, %v644_v32 }
 0x25f   : > { %3395 = vtanh.f32 %v873_v34 }
 0x269   : > { %v3396_v37 = vpop.eup %3395 }
 0x26a   : > { %v876_v38 = vmul.f32 %v3396_v37, %v875_v36  ;;  %v1152_v37 = vld [vmem:[%s1149_s28 + $0x8] sm:$0xf]  ;;  %s2738_s28 = sshll.u32 %s4027_s29, 2 }
 0x26c   : > { %v878_v41 = vadd.f32 %v877_v39, %v876_v38 }
 0x26e   : > { %v886_v42 = vsel %vm885_vm12, %v878_v41, 0.0  ;;  %v890_v43 = vsel %vm885_vm12, %v878_v41, %v3985_v61 }
 0x26f   : > { %889 = vst.msk [vmem:[%s888_s15] sm:$0xf] %vm354_vm0, %v886_v42  ;;  %2955 = vmatmul.mubr.msk.f32.vlgmr.msra.gmra.mrb[6].mxu0 %vm384_vm3, %v890_v43  ;;  %2966 = vmatmul.mubr.msk.f32.vlgmr.msra.gmra.mrb[6].mxu1 %vm384_vm3, %v890_v43  ;;  %s2725_s15 = sshll.u32 %s4020_s17, 2  ;;  %s1402_s17 = smul.u32 12, %s3916_s24 }
 0x270   : > { %3194 = vmatpush3.bf16.msra.mxu0 %v3924_v22  ;;  %2976 = vmatprep.mubr.msk.f32.mxu0 %vm3644_vm1, %v3645_v1  ;;  %s1396_s16 = scalar_lea.vmem %s3981_s1, %s2725_s15 [#allocation7]  ;;  %s1656_s24 = smul.u32 12, %s4027_s29 }
 0x271   : > { %3195 = vmatprep.subr.bf16.mxu0 %v3643_v0  ;;  %3200 = vmatpush3.bf16.msra.mxu1 %v3883_v6  ;;  %s1403_s12 = scalar_lea.vmem %s3847_s10, %s1402_s17 [#allocation2]  ;;  %s1904_s15 = scalar_lea.vmem %s3981_s1, %s2738_s28 [#allocation7] }
 0x272   : > { %3201 = vmatprep.subr.bf16.mxu1 %v3643_v0  ;;  %2987 = vmatprep.mubr.msk.f32.mxu1 %vm3644_vm1, %v3645_v1  ;;  %s1657_s13 = scalar_lea.vmem %s3847_s10, %s1656_s24 [#allocation2]  ;;  %s1910_s29 = smul.u32 12, %s3933_s14 }
 0x273   : > { %s2744_s17 = sshll.u32 %s3933_s14, 2  ;;  %s2164_s14 = smul.u32 12, %s4034_s9 }
 0x274   : > { %3197 = vmatpush3.bf16.msra.mxu0 %v3942_v27 }
 0x275   : > { %3204 = vmatprep.subr.bf16.mxu0 %v3643_v0  ;;  %3203 = vmatpush3.bf16.msra.mxu1 %v3899_v14 }
 0x276   : > { %3210 = vmatprep.subr.bf16.mxu1 %v3643_v0 }
 0x277   : > { %2977 = vmatmul.mubr.msk.f32.vlgmr.msra.gmra.mrb[8].mxu0 %vm384_vm3, %v890_v43 }
 0x278   : > { %3206 = vmatpush3.bf16.msra.mxu0 %v3892_v10  ;;  %2998 = vmatprep.mubr.msk.f32.mxu0 %vm3644_vm1, %v3645_v1 }
 0x279   : > { %3207 = vmatprep.subr.bf16.mxu0 %v3643_v0 }
 0x27c   : > { %3209 = vmatpush3.bf16.msra.mxu0 %v3903_v15 }
 0x27d   : > { %3216 = vmatprep.subr.bf16.mxu0 %v3643_v0 }
 0x342   : > { %v968_v47 = vpop.f32.mrb[6].mxu0  ;;  %v1038_v48 = vpop.f32.mrb[6].mxu1 }
 0x343   : > { %v1112_v49 = vadd.f32 %v968_v47, %v896_v44  ;;  %v1119_v50 = vadd.f32 %v1038_v48, %v897_v45  ;;  %v2956_v51 = vpop.f32.mrb[7].mxu0  ;;  %v2967_v52 = vpop.f32.mrb[7].mxu1 }
 0x344   : > { %v1392_v45 = vpop.permute.xlu1 %1391 }
 0x345   : > { %v2717_v53 = vmul.f32 -1.442695, %v1112_v49  ;;  %v2718_v54 = vmul.f32 -1.442695, %v1119_v50  ;;  %vm1393_vm14 = vcmp.eq.s32.totalorder %v1392_v45, 1 }
 0x346   : > { %v1404_v50 = vld [vmem:[%s1403_s12] sm:$0xf] }
 0x347   : > { %3397 = vpow2.f32 %v2717_v53 }
 0x348   : > { %3399 = vpow2.f32 %v2718_v54  ;;  %v1405_v54 = vld [vmem:[%s1403_s12 + $0x4] sm:$0xf] }
 0x34a   : > { %v1108_v55 = vpop.f32.mrb[8].mxu0 }
 0x34b   : > { %v2978_v56 = vpop.f32.mrb[9].mxu0  ;;  %v1109_v61 = vadd.f32 %v3975_v46, %v1108_v55 }
 0x351   : > { %v3398_v57 = vpop.eup %3397 }
 0x352   : > { %v1116_v58 = vadd.f32 1.0, %v3398_v57  ;;  %v3400_v59 = vpop.eup %3399 }
 0x353   : > { %v1123_v60 = vadd.f32 1.0, %v3400_v59 }
 0x354   : > { %3401 = vrcp.f32 %v1116_v58 }
 0x355   : > { %3403 = vrcp.f32 %v1123_v60 }
 0x35e   : > { %v3402_v62 = vpop.eup %3401 }
 0x35f   : > { %v1126_v3 = vmul.f32 %v3402_v62, %v1109_v61  ;;  %v3404_v5 = vpop.eup %3403 }
 0x360   : > { %v1129_v7 = vsub.f32 1.0, %v3404_v5  ;;  %v1131_v12 = vmul.f32 %v3404_v5, %v890_v43 }
 0x361   : > { %v1127_v4 = vadd.f32 %v1126_v3, %v898_v63 }
 0x363   : > { %3405 = vtanh.f32 %v1127_v4 }
 0x36d   : > { %v3406_v8 = vpop.eup %3405 }
 0x36e   : > { %v1130_v11 = vmul.f32 %v3406_v8, %v1129_v7  ;;  %v1406_v8 = vld [vmem:[%s1403_s12 + $0x8] sm:$0xf]  ;;  %s2158_s12 = scalar_lea.vmem %s3981_s1, %s2744_s17 [#allocation7]  ;;  %s2456_s17 = sshll.u32 %s3864_s30, 4  ;;  %s4211_s17 = int_to_ptr.vmem [resolvable:$true] %s2456_s17 }
 0x370   : > { %v1132_v13 = vadd.f32 %v1131_v12, %v1130_v11 }
 0x372   : > { %v1140_v16 = vsel %vm1139_vm13, %v1132_v13, 0.0  ;;  %v1144_v17 = vsel %vm1139_vm13, %v1132_v13, %v890_v43 }
 0x373   : > { %1143 = vst.msk [vmem:[%s1142_s11] sm:$0xf] %vm354_vm0, %v1140_v16  ;;  %2988 = vmatmul.mubr.msk.f32.vlgmr.msra.gmra.mrb[8].mxu1 %vm384_vm3, %v1144_v17  ;;  %2999 = vmatmul.mubr.msk.f32.vlgmr.msra.gmra.mrb[10].mxu0 %vm384_vm3, %v1144_v17  ;;  %s1650_s11 = scalar_lea.vmem %s3981_s1, %s2732_s27 [#allocation7]  ;;  %s2165_s27 = scalar_lea.vmem %s3847_s10, %s2164_s14 [#allocation2] }
 0x374   : > { %3212 = vmatpush3.bf16.msra.mxu1 %v3924_v22  ;;  %3009 = vmatprep.mubr.msk.f32.mxu1 %vm3644_vm1, %v3645_v1 }
 0x375   : > { %3213 = vmatprep.subr.bf16.mxu1 %v3643_v0  ;;  %3218 = vmatpush3.bf16.msra.mxu0 %v3883_v6 }
 0x376   : > { %3219 = vmatprep.subr.bf16.mxu0 %v3643_v0  ;;  %3020 = vmatprep.mubr.msk.f32.mxu0 %vm3644_vm1, %v3645_v1 }
 0x378   : > { %3215 = vmatpush3.bf16.msra.mxu1 %v3942_v27 }
 0x379   : > { %3222 = vmatprep.subr.bf16.mxu1 %v3643_v0  ;;  %3221 = vmatpush3.bf16.msra.mxu0 %v3899_v14 }
 0x37a   : > { %3228 = vmatprep.subr.bf16.mxu0 %v3643_v0 }
 0x37b   : > { %3010 = vmatmul.mubr.msk.f32.vlgmr.msra.gmra.mrb[10].mxu1 %vm384_vm3, %v1144_v17 }
 0x37c   : > { %3224 = vmatpush3.bf16.msra.mxu1 %v3892_v10  ;;  %3031 = vmatprep.mubr.msk.f32.mxu1 %vm3644_vm1, %v3645_v1 }
 0x37d   : > { %3225 = vmatprep.subr.bf16.mxu1 %v3643_v0 }
 0x380   : > { %3227 = vmatpush3.bf16.msra.mxu1 %v3903_v15 }
 0x381   : > { %3234 = vmatprep.subr.bf16.mxu1 %v3643_v0 }
 0x446   : > { %v1222_v20 = vpop.f32.mrb[8].mxu1  ;;  %v1292_v21 = vpop.f32.mrb[10].mxu0 }
 0x447   : > { %v1366_v23 = vadd.f32 %v1222_v20, %v1150_v19  ;;  %v2989_v25 = vpop.f32.mrb[9].mxu1  ;;  %v3000_v26 = vpop.f32.mrb[11].mxu0  ;;  %v1373_v2 = vadd.f32 %v1292_v21, %v1151_v24 }
 0x448   : > { %v1646_v20 = vpop.permute.xlu0 %1645  ;;  %v1658_v25 = vld [vmem:[%s1657_s13] sm:$0xf] }
 0x449   : > { %v2723_v18 = vmul.f32 -1.442695, %v1366_v23  ;;  %v2724_v28 = vmul.f32 -1.442695, %v1373_v2  ;;  %vm1647_vm15 = vcmp.eq.s32.totalorder %v1646_v20, 1 }
 0x44b   : > { %3407 = vpow2.f32 %v2723_v18 }
 0x44c   : > { %3409 = vpow2.f32 %v2724_v28  ;;  %v1659_v28 = vld [vmem:[%s1657_s13 + $0x4] sm:$0xf] }
 0x44e   : > { %v1362_v29 = vpop.f32.mrb[10].mxu1 }
 0x44f   : > { %v3011_v30 = vpop.f32.mrb[11].mxu1  ;;  %v1363_v35 = vadd.f32 %v3975_v46, %v1362_v29 }
 0x455   : > { %v3408_v31 = vpop.eup %3407 }
 0x456   : > { %v1370_v32 = vadd.f32 1.0, %v3408_v31  ;;  %v3410_v33 = vpop.eup %3409 }
 0x457   : > { %v1377_v34 = vadd.f32 1.0, %v3410_v33 }
 0x458   : > { %3411 = vrcp.f32 %v1370_v32 }
 0x459   : > { %3413 = vrcp.f32 %v1377_v34 }
 0x462   : > { %v3412_v36 = vpop.eup %3411 }
 0x463   : > { %v1380_v38 = vmul.f32 %v3412_v36, %v1363_v35  ;;  %v3414_v40 = vpop.eup %3413 }
 0x464   : > { %v1383_v41 = vsub.f32 1.0, %v3414_v40  ;;  %v1385_v44 = vmul.f32 %v3414_v40, %v1144_v17 }
 0x465   : > { %v1381_v39 = vadd.f32 %v1380_v38, %v1152_v37 }
 0x467   : > { %3415 = vtanh.f32 %v1381_v39 }
 0x471   : > { %v3416_v42 = vpop.eup %3415 }
 0x472   : > { %v1384_v43 = vmul.f32 %v3416_v42, %v1383_v41  ;;  %v1660_v42 = vld [vmem:[%s1657_s13 + $0x8] sm:$0xf]  ;;  %s2440_s13 = sshll.u32 %s3981_s1, 4  ;;  %s4204_s13 = int_to_ptr.vmem [resolvable:$true] %s2440_s13 }
 0x473   : > { %s3517_s14 = scalar_lea.vmem %s4204_s13, 512 }
 0x474   : > { %v1386_v47 = vadd.f32 %v1385_v44, %v1384_v43  ;;  %p3518_p3 = scmp.ne.s32.totalorder %s4204_s13, %s3517_s14 }
 0x476   : > { %v1394_v48 = vsel %vm1393_vm14, %v1386_v47, 0.0  ;;  %v1398_v49 = vsel %vm1393_vm14, %v1386_v47, %v1144_v17  ;;  %p3519_p13 = pnand %p3518_p3, %p4303_p11 }
 0x477   : > { %1397 = vst.msk [vmem:[%s1396_s16] sm:$0xf] %vm354_vm0, %v1394_v48  ;;  %3021 = vmatmul.mubr.msk.f32.vlgmr.msra.gmra.mrb[12].mxu0 %vm384_vm3, %v1398_v49  ;;  %3032 = vmatmul.mubr.msk.f32.vlgmr.msra.gmra.mrb[12].mxu1 %vm384_vm3, %v1398_v49  ;;  %s1911_s16 = scalar_lea.vmem %s3847_s10, %s1910_s29 [#allocation2]  ;;  %s2750_s10 = sshll.u32 %s4034_s9, 2 }
 0x478   : > { %3230 = vmatpush3.bf16.msra.mxu0 %v3924_v22  ;;  %3042 = vmatprep.mubr.msk.f32.mxu0 %vm3644_vm1, %v3645_v1  ;;  %s2412_s24 = scalar_lea.vmem %s3981_s1, %s2750_s10 [#allocation7]  ;;  %p3520_p7 = pneg %p3519_p13 }
 0x479   : > { %3231 = vmatprep.subr.bf16.mxu0 %v3643_v0  ;;  %3236 = vmatpush3.bf16.msra.mxu1 %v3883_v6 }
 0x47a   : > { %3237 = vmatprep.subr.bf16.mxu1 %v3643_v0  ;;  %3053 = vmatprep.mubr.msk.f32.mxu1 %vm3644_vm1, %v3645_v1 }
 0x47c   : > { %3233 = vmatpush3.bf16.msra.mxu0 %v3942_v27 }
 0x47d   : > { %3240 = vmatprep.subr.bf16.mxu0 %v3643_v0  ;;  %3239 = vmatpush3.bf16.msra.mxu1 %v3899_v14 }
 0x47e   : > { %3246 = vmatprep.subr.bf16.mxu1 %v3643_v0 }
 0x47f   : > { %3043 = vmatmul.mubr.msk.f32.vlgmr.msra.gmra.mrb[14].mxu0 %vm384_vm3, %v1398_v49 }
 0x480   : > { %3242 = vmatpush3.bf16.msra.mxu0 %v3892_v10  ;;  %3064 = vmatprep.mubr.msk.f32.mxu0 %vm3644_vm1, %v3645_v1 }
 0x481   : > { %3243 = vmatprep.subr.bf16.mxu0 %v3643_v0 }
 0x484   : > { %3245 = vmatpush3.bf16.msra.mxu0 %v3903_v15 }
 0x485   : > { %3252 = vmatprep.subr.bf16.mxu0 %v3643_v0 }
 0x54a   : > { %v1476_v51 = vpop.f32.mrb[12].mxu0  ;;  %v1546_v52 = vpop.f32.mrb[12].mxu1 }
 0x54b   : > { %v1620_v53 = vadd.f32 %v1476_v51, %v1404_v50  ;;  %v3022_v55 = vpop.f32.mrb[13].mxu0  ;;  %v3033_v56 = vpop.f32.mrb[13].mxu1  ;;  %v1627_v58 = vadd.f32 %v1546_v52, %v1405_v54 }
 0x54c   : > { %v1900_v51 = vpop.permute.xlu1 %1899 }
 0x54d   : > { %v2730_v57 = vmul.f32 -1.442695, %v1620_v53  ;;  %v2731_v59 = vmul.f32 -1.442695, %v1627_v58  ;;  %vm1901_vm2 = vcmp.eq.s32.totalorder %v1900_v51, 1 }
 0x54f   : > { %3417 = vpow2.f32 %v2730_v57 }
 0x550   : > { %3419 = vpow2.f32 %v2731_v59 }
 0x552   : > { %v1616_v60 = vpop.f32.mrb[14].mxu0 }
 0x553   : > { %v3044_v61 = vpop.f32.mrb[15].mxu0  ;;  %v1617_v5 = vadd.f32 %v3975_v46, %v1616_v60 }
 0x559   : > { %v3418_v62 = vpop.eup %3417 }
 0x55a   : > { %v1624_v63 = vadd.f32 1.0, %v3418_v62  ;;  %v3420_v3 = vpop.eup %3419 }
 0x55b   : > { %v1631_v4 = vadd.f32 1.0, %v3420_v3 }
 0x55c   : > { %3421 = vrcp.f32 %v1624_v63 }
 0x55d   : > { %3423 = vrcp.f32 %v1631_v4 }
 0x566   : > { %v3422_v7 = vpop.eup %3421 }
 0x567   : > { %v1634_v9 = vmul.f32 %v3422_v7, %v1617_v5  ;;  %v3424_v12 = vpop.eup %3423 }
 0x568   : > { %v1637_v13 = vsub.f32 1.0, %v3424_v12  ;;  %v1639_v19 = vmul.f32 %v3424_v12, %v1398_v49 }
 0x569   : > { %v1635_v11 = vadd.f32 %v1634_v9, %v1406_v8  ;;  %v1914_v9 = vld [vmem:[%s1911_s16 + $0x8] sm:$0xf] }
 0x56b   : > { %3425 = vtanh.f32 %v1635_v11 }
 0x575   : > { %v3426_v16 = vpop.eup %3425 }
 0x576   : > { %v1638_v17 = vmul.f32 %v3426_v16, %v1637_v13 }
 0x578   : > { %v1640_v21 = vadd.f32 %v1639_v19, %v1638_v17  ;;  %v2154_v19 = vpop.permute.xlu0 %2153 }
 0x579   : > { %vm2155_vm4 = vcmp.eq.s32.totalorder %v2154_v19, 1 }
 0x57a   : > { %v1648_v23 = vsel %vm1647_vm15, %v1640_v21, 0.0  ;;  %v1652_v24 = vsel %vm1647_vm15, %v1640_v21, %v1398_v49 }
 0x57b   : > { %1651 = vst.msk [vmem:[%s1650_s11] sm:$0xf] %vm354_vm0, %v1648_v23  ;;  %3054 = vmatmul.mubr.msk.f32.vlgmr.msra.gmra.mrb[14].mxu1 %vm384_vm3, %v1652_v24  ;;  %3065 = vmatmul.mubr.msk.f32.vlgmr.msra.gmra.mrb[16].mxu0 %vm384_vm3, %v1652_v24  ;;  %s2759_s11 = sshll.u32 %s3627_s21, 9 }
 0x57c   : > { %3248 = vmatpush3.bf16.msra.mxu1 %v3924_v22  ;;  %3075 = vmatprep.mubr.msk.f32.mxu1 %vm3644_vm1, %v3645_v1  ;;  %s4200_s29 = scalar_lea.hbm %s4289_s4, %s2759_s11 }
 0x57d   : > { %3249 = vmatprep.subr.bf16.mxu1 %v3643_v0  ;;  %3254 = vmatpush3.bf16.msra.mxu0 %v3883_v6 }
 0x57e   : > { %3255 = vmatprep.subr.bf16.mxu0 %v3643_v0  ;;  %3086 = vmatprep.mubr.msk.f32.mxu0 %vm3644_vm1, %v3645_v1 }
 0x580   : > { %3251 = vmatpush3.bf16.msra.mxu1 %v3942_v27 }
 0x581   : > { %3258 = vmatprep.subr.bf16.mxu1 %v3643_v0  ;;  %3257 = vmatpush3.bf16.msra.mxu0 %v3899_v14 }
 0x582   : > { %3264 = vmatprep.subr.bf16.mxu0 %v3643_v0 }
 0x583   : > { %3076 = vmatmul.mubr.msk.f32.vlgmr.msra.gmra.mrb[16].mxu1 %vm384_vm3, %v1652_v24 }
 0x584   : > { %3260 = vmatpush3.bf16.msra.mxu1 %v3892_v10  ;;  %3097 = vmatprep.mubr.msk.f32.mxu1 %vm3644_vm1, %v3645_v1 }
 0x585   : > { %3261 = vmatprep.subr.bf16.mxu1 %v3643_v0 }
 0x588   : > { %3263 = vmatpush3.bf16.msra.mxu1 %v3903_v15 }
 0x589   : > { %3270 = vmatprep.subr.bf16.mxu1 %v3643_v0 }
 0x64e   : > { %v1730_v26 = vpop.f32.mrb[14].mxu1  ;;  %v1800_v18 = vpop.f32.mrb[16].mxu0 }
 0x64f   : > { %v1874_v2 = vadd.f32 %v1730_v26, %v1658_v25  ;;  %v3055_v29 = vpop.f32.mrb[15].mxu1  ;;  %v3066_v30 = vpop.f32.mrb[17].mxu0  ;;  %v1881_v32 = vadd.f32 %v1800_v18, %v1659_v28  ;;  %v2166_v26 = vld [vmem:[%s2165_s27] sm:$0xf] }
 0x650   : > { %v2167_v29 = vld [vmem:[%s2165_s27 + $0x4] sm:$0xf] }
 0x651   : > { %v2736_v31 = vmul.f32 -1.442695, %v1874_v2  ;;  %v2737_v33 = vmul.f32 -1.442695, %v1881_v32 }
 0x653   : > { %3427 = vpow2.f32 %v2736_v31 }
 0x654   : > { %3429 = vpow2.f32 %v2737_v33 }
 0x656   : > { %v1870_v34 = vpop.f32.mrb[16].mxu1 }
 0x657   : > { %v3077_v35 = vpop.f32.mrb[17].mxu1  ;;  %v1871_v40 = vadd.f32 %v3975_v46, %v1870_v34 }
 0x65d   : > { %v3428_v36 = vpop.eup %3427 }
 0x65e   : > { %v1878_v37 = vadd.f32 1.0, %v3428_v36  ;;  %v3430_v38 = vpop.eup %3429 }
 0x65f   : > { %v1885_v39 = vadd.f32 1.0, %v3430_v38 }
 0x660   : > { %3431 = vrcp.f32 %v1878_v37 }
 0x661   : > { %3433 = vrcp.f32 %v1885_v39  ;;  %v2168_v39 = vld [vmem:[%s2165_s27 + $0x8] sm:$0xf]  ;;  %s3647_s27 = smov [#allocation7]  }
 0x662   : > { %s3521_s10 = sshll.u32 %s3647_s27, 4  ;;  %s3522_s10 = int_to_ptr.vmem [resolvable:$false] %s3521_s10 }
 0x663   : > { %s3523_s11 = scalar_lea.vmem %s3522_s10, 1024  ;;  %p3524_p10 = scmp.lt.s32.totalorder %s4204_s13, %s3522_s10 }
 0x664   : > { %p3525_p12 = scmp.lt.s32.totalorder %s3523_s11, %s3517_s14 }
 0x666   : > { %p3526_p9 = por %p3525_p12, %p3524_p10 }
 0x668   : > { %p3527_p1 = pnand %p3526_p9, %p3520_p7 }
 0x66a   : > { %v3432_v41 = vpop.eup %3431 }
 0x66b   : > { %v1888_v43 = vmul.f32 %v3432_v41, %v1871_v40  ;;  %v3434_v45 = vpop.eup %3433 }
 0x66c   : > { %v1891_v47 = vsub.f32 1.0, %v3434_v45  ;;  %v1893_v50 = vmul.f32 %v3434_v45, %v1652_v24  ;;  %v2408_v45 = vpop.permute.xlu1 %2407 }
 0x66d   : > { %v1889_v44 = vadd.f32 %v1888_v43, %v1660_v42 }
 0x66f   : > { %3435 = vtanh.f32 %v1889_v44 }
 0x679   : > { %v3436_v48 = vpop.eup %3435 }
 0x67a   : > { %v1892_v49 = vmul.f32 %v3436_v48, %v1891_v47 }
 0x67c   : > { %v1894_v52 = vadd.f32 %v1893_v50, %v1892_v49 }
 0x67e   : > { %v1902_v53 = vsel %vm1901_vm2, %v1894_v52, 0.0  ;;  %v1906_v54 = vsel %vm1901_vm2, %v1894_v52, %v1652_v24 }
 0x67f   : > { %1905 = vst.msk [vmem:[%s1904_s15] sm:$0xf] %vm354_vm0, %v1902_v53  ;;  %3087 = vmatmul.mubr.msk.f32.vlgmr.msra.gmra.mrb[18].mxu0 %vm384_vm3, %v1906_v54  ;;  %3098 = vmatmul.mubr.msk.f32.vlgmr.msra.gmra.mrb[18].mxu1 %vm384_vm3, %v1906_v54 }
 0x680   : > { %3266 = vmatpush3.bf16.msra.mxu0 %v3924_v22  ;;  %3108 = vmatprep.mubr.msk.f32.mxu0 %vm3644_vm1, %v3645_v1 }
 0x681   : > { %3267 = vmatprep.subr.bf16.mxu0 %v3643_v0  ;;  %3272 = vmatpush3.bf16.msra.mxu1 %v3883_v6  ;;  %v1912_v6 = vld [vmem:[%s1911_s16] sm:$0xf] }
 0x682   : > { %3273 = vmatprep.subr.bf16.mxu1 %v3643_v0  ;;  %3119 = vmatprep.mubr.msk.f32.mxu1 %vm3644_vm1, %v3645_v1 }
 0x684   : > { %3269 = vmatpush3.bf16.msra.mxu0 %v3942_v27 }
 0x685   : > { %3276 = vmatprep.subr.bf16.mxu0 %v3643_v0  ;;  %3275 = vmatpush3.bf16.msra.mxu1 %v3899_v14  ;;  %v1913_v14 = vld [vmem:[%s1911_s16 + $0x4] sm:$0xf]  ;;  %s2756_s16 = sshll.u32 %s3627_s21, 6  ;;  %s2417_s21 = scalar_lea.sflag [#allocation4], %s3843_s25 }
 0x686   : > { %3282 = vmatprep.subr.bf16.mxu1 %v3643_v0 }
 0x687   : > { %3109 = vmatmul.mubr.msk.f32.vlgmr.msra.gmra.mrb[20].mxu0 %vm384_vm3, %v1906_v54 }
 0x688   : > { %3278 = vmatpush3.bf16.msra.mxu0 %v3892_v10  ;;  %3130 = vmatprep.mubr.msk.f32.mxu0 %vm3644_vm1, %v3645_v1 }
 0x689   : > { %3279 = vmatprep.subr.bf16.mxu0 %v3643_v0 }
 0x68c   : > { %3281 = vmatpush3.bf16.msra.mxu0 %v3903_v15 }
 0x752   : > { %v1984_v55 = vpop.f32.mrb[18].mxu0  ;;  %v2054_v56 = vpop.f32.mrb[18].mxu1 }
 0x753   : > { %v2128_v57 = vadd.f32 %v1984_v55, %v1912_v6  ;;  %v3088_v58 = vpop.f32.mrb[19].mxu0  ;;  %v3099_v59 = vpop.f32.mrb[19].mxu1  ;;  %v2135_v61 = vadd.f32 %v2054_v56, %v1913_v14 }
 0x755   : > { %v2742_v60 = vmul.f32 -1.442695, %v2128_v57  ;;  %v2743_v10 = vmul.f32 -1.442695, %v2135_v61 }
 0x757   : > { %3437 = vpow2.f32 %v2742_v60 }
 0x758   : > { %3439 = vpow2.f32 %v2743_v10 }
 0x75a   : > { %v2124_v62 = vpop.f32.mrb[20].mxu0 }
 0x75b   : > { %v3110_v63 = vpop.f32.mrb[21].mxu0  ;;  %v2125_v7 = vadd.f32 %v3975_v46, %v2124_v62 }
 0x761   : > { %v3438_v3 = vpop.eup %3437 }
 0x762   : > { %v2132_v4 = vadd.f32 1.0, %v3438_v3  ;;  %v3440_v15 = vpop.eup %3439 }
 0x763   : > { %v2139_v5 = vadd.f32 1.0, %v3440_v15 }
 0x764   : > { %3441 = vrcp.f32 %v2132_v4 }
 0x765   : > { %3443 = vrcp.f32 %v2139_v5 }
 0x76e   : > { %v3442_v8 = vpop.eup %3441 }
 0x76f   : > { %v2142_v11 = vmul.f32 %v3442_v8, %v2125_v7  ;;  %v3444_v13 = vpop.eup %3443 }
 0x770   : > { %v2145_v16 = vsub.f32 1.0, %v3444_v13  ;;  %v2147_v21 = vmul.f32 %v3444_v13, %v1906_v54 }
 0x771   : > { %v2143_v12 = vadd.f32 %v2142_v11, %v1914_v9 }
 0x773   : > { %3445 = vtanh.f32 %v2143_v12 }
 0x77d   : > { %v3446_v17 = vpop.eup %3445 }
 0x77e   : > { %v2146_v20 = vmul.f32 %v3446_v17, %v2145_v16 }
 0x780   : > { %v2148_v23 = vadd.f32 %v2147_v21, %v2146_v20 }
 0x782   : > { %v2156_v24 = vsel %vm2155_vm4, %v2148_v23, 0.0  ;;  %v2160_v25 = vsel %vm2155_vm4, %v2148_v23, %v1906_v54 }
 0x783   : > { %2159 = vst.msk [vmem:[%s2158_s12] sm:$0xf] %vm354_vm0, %v2156_v24  ;;  %3120 = vmatmul.mubr.msk.f32.vlgmr.msra.gmra.mrb[20].mxu1 %vm384_vm3, %v2160_v25  ;;  %3131 = vmatmul.mubr.msk.f32.vlgmr.msra.gmra.mrb[22].mxu0 %vm384_vm3, %v2160_v25  ;;  %s4209_s12 = scalar_lea.hbm %s4290_s5, %s2756_s16 }
 0x784   : > { %3284 = vmatpush3.bf16.msra.mxu1 %v3924_v22  ;;  %3141 = vmatprep.mubr.msk.f32.mxu1 %vm3644_vm1, %v3645_v1  ;;  %vm2409_vm1 = vcmp.eq.s32.totalorder %v2408_v45, 1 }
 0x785   : > { %3285 = vmatprep.subr.bf16.mxu1 %v3643_v0 }
 0x788   : > { %3287 = vmatpush3.bf16.msra.mxu1 %v3942_v27 }
 0x78b   : > { %3142 = vmatmul.mubr.msk.f32.vlgmr.msra.gmra.mrb[22].mxu1 %vm384_vm3, %v2160_v25 }
 0x856   : > { %v2238_v18 = vpop.f32.mrb[20].mxu1  ;;  %v2308_v2 = vpop.f32.mrb[22].mxu0 }
 0x857   : > { %v2382_v28 = vadd.f32 %v2238_v18, %v2166_v26  ;;  %v3121_v30 = vpop.f32.mrb[21].mxu1  ;;  %v3132_v31 = vpop.f32.mrb[23].mxu0  ;;  %v2389_v22 = vadd.f32 %v2308_v2, %v2167_v29 }
 0x859   : > { %v2748_v32 = vmul.f32 -1.442695, %v2382_v28  ;;  %v2749_v33 = vmul.f32 -1.442695, %v2389_v22 }
 0x85b   : > { %3447 = vpow2.f32 %v2748_v32 }
 0x85c   : > { %3449 = vpow2.f32 %v2749_v33 }
 0x85e   : > { %v2378_v1 = vpop.f32.mrb[22].mxu1 }
 0x85f   : > { %v3143_v0 = vpop.f32.mrb[23].mxu1  ;;  %v2379_v37 = vadd.f32 %v3975_v46, %v2378_v1 }
 0x865   : > { %v3448_v27 = vpop.eup %3447 }
 0x866   : > { %v2386_v34 = vadd.f32 1.0, %v3448_v27  ;;  %v3450_v35 = vpop.eup %3449 }
 0x867   : > { %v2393_v36 = vadd.f32 1.0, %v3450_v35 }
 0x868   : > { %3451 = vrcp.f32 %v2386_v34 }
 0x869   : > { %3453 = vrcp.f32 %v2393_v36 }
 0x872   : > { %v3452_v38 = vpop.eup %3451 }
 0x873   : > { %v2396_v40 = vmul.f32 %v3452_v38, %v2379_v37  ;;  %v3454_v42 = vpop.eup %3453 }
 0x874   : > { %v2399_v43 = vsub.f32 1.0, %v3454_v42  ;;  %v2401_v47 = vmul.f32 %v3454_v42, %v2160_v25 }
 0x875   : > { %v2397_v41 = vadd.f32 %v2396_v40, %v2168_v39 }
 0x877   : > { %3455 = vtanh.f32 %v2397_v41 }
 0x881   : > { %v3456_v44 = vpop.eup %3455 }
 0x882   : > { %v2400_v46 = vmul.f32 %v3456_v44, %v2399_v43 }
 0x884   : > { %v2402_v48 = vadd.f32 %v2401_v47, %v2400_v46 }
 0x886   : > { %v2410_v49 = vsel %vm2409_vm1, %v2402_v48, 0.0  ;;  %v2414_v50 = vsel %vm2409_vm1, %v2402_v48, %v2160_v25 }
 0x887   : > { %2413 = vst.msk [vmem:[%s2412_s24] sm:$0xf] %vm354_vm0, %v2410_v49  ;;  %2415 = vst.msk [vmem:[%s3864_s30] sm:$0xf] %vm354_vm0, %v2414_v50 }
 0x888   : > { %3530 = shalt.err (!%p3527_p1)
}
 0x889   : > { %s3531_s30 = scalar_lea.hbm %s4200_s29, 512  ;;  %s3535_s15 = scalar_lea.hbm %s4289_s4, 1024 }
 0x88a   : > { %p3532_p5 = scmp.ne.s32.totalorder %s4200_s29, %s3531_s30  ;;  %p3536_p6 = scmp.lt.u32.totalorder %s4200_s29, %s4289_s4 }
 0x88b   : > { %p3537_p8 = scmp.lt.u32.totalorder %s3535_s15, %s3531_s30  ;;  %p3539_p3 = scmp.lt.u32.totalorder %s3531_s30, %s4200_s29 }
 0x88c   : > { %p3533_p2 = pnand %p3532_p5, %p4303_p11 }
 0x88d   : > { %p3538_p0 = por %p3537_p8, %p3536_p6 }
 0x88e   : > { %p3534_p4 = pneg %p3533_p2 }
 0x88f   : > { %p3540_p13 = por %p3539_p3, %p3538_p0 }
 0x891   : > { %p3541_p7 = pnand %p3540_p13, %p3534_p4 }
 0x893   : > { %3544 = shalt.err (!%p3541_p7)
}
 0x894   : > { %s3648_s9 = smov 64   ;;  %s3649_s14 = smov 4  }
 0x895   : > { %3297 = dma.vmem_to_hbm [thread:$0]  (%p4303_p11), %s4204_s13, 512, %s4200_s29, %s2417_s21, %s3648_s9, %s3648_s9, %s3649_s14  }
 0x896   : > { %s2422_s27 = scalar_lea.sflag [#allocation9], %s3843_s25  ;;  %s3545_s10 = scalar_lea.vmem %s4211_s17, 64 }
 0x897   : > { %p3546_p10 = scmp.ne.s32.totalorder %s4211_s17, %s3545_s10  ;;  %s3650_s11 = smov [#allocation8]  }
 0x898   : > { %s3549_s30 = sshll.u32 %s3650_s11, 4  ;;  %s3550_s30 = int_to_ptr.vmem [resolvable:$false] %s3549_s30 }
 0x899   : > { %p3547_p12 = pnand %p3546_p10, %p4303_p11  ;;  %s3551_s24 = scalar_lea.vmem %s3550_s30, 128 }
 0x89a   : > { %p3552_p1 = scmp.lt.s32.totalorder %s4211_s17, %s3550_s30  ;;  %p3553_p5 = scmp.lt.s32.totalorder %s3551_s24, %s3545_s10 }
 0x89b   : > { %p3548_p9 = pneg %p3547_p12 }
 0x89c   : > { %p3554_p2 = por %p3553_p5, %p3552_p1 }
 0x89e   : > { %p3555_p4 = pnand %p3554_p2, %p3548_p9 }
 0x8a0   : > { %3558 = shalt.err (!%p3555_p4)
}
 0x8a1   : > { %s3559_s25 = scalar_lea.hbm %s4209_s12, 64  ;;  %s3563_s21 = scalar_lea.hbm %s4290_s5, 128 }
 0x8a2   : > { %p3560_p6 = scmp.ne.s32.totalorder %s4209_s12, %s3559_s25  ;;  %p3564_p3 = scmp.lt.u32.totalorder %s4209_s12, %s4290_s5 }
 0x8a3   : > { %p3565_p13 = scmp.lt.u32.totalorder %s3563_s21, %s3559_s25  ;;  %p3567_p10 = scmp.lt.u32.totalorder %s3559_s25, %s4209_s12 }
 0x8a4   : > { %p3561_p8 = pnand %p3560_p6, %p4303_p11 }
 0x8a5   : > { %p3566_p7 = por %p3565_p13, %p3564_p3 }
 0x8a6   : > { %p3562_p0 = pneg %p3561_p8 }
 0x8a7   : > { %p3568_p12 = por %p3567_p10, %p3566_p7 }
 0x8a9   : > { %p3569_p9 = pnand %p3568_p12, %p3562_p0 }
 0x8ab   : > { %3572 = shalt.err (!%p3569_p9)
}
 0x8ac   : > { %3298 = dma.vmem_to_hbm [thread:$0]  (%p4303_p11), %s4211_s17, 64, %s4209_s12, %s2422_s27  }
 0x8ad PF: > { %s2468_s16 = sand.u32 1, %s3615_s18   ;;  %p4304_p1 = scmp.ne.s32.totalorder %s4297_s8, 0 }
 0x8ae   : > { %p4305_p5 = scmp.ge.s32.totalorder %s3635_s23, 2  ;;  %s2469_s1 = scalar_lea.sflag [#allocation4], %s2468_s16 }
 0x8b0   : > { %p3309_p2 = pnand %p4305_p5, %p4304_p1 }
 0x8b2   : > { %3606 = dma.done.wait (!%p3309_p2), %s2469_s1, 512  }
 0x8b3   : > { %3608 = vsyncadd (!%p3309_p2), %s2469_s1, 4294966784  ;;  %s2478_s9 = scalar_lea.sflag [#allocation9], %s2468_s16 }
 0x8b4   : > { %3610 = dma.done.wait (!%p3309_p2), %s2478_s9, 64  }
 0x8b5   : > { %3612 = vsyncadd (!%p3309_p2), %s2478_s9, 4294967232  ;;  %s28_s23 = sadd.s32 1, %s3635_s23   ;;  %s4306_s18 = smov %s3619_s19 }
 0x8b6   : > { %p25_p4 = scmp.ge.s32.totalorder %s28_s23, 4   ;;  %s4307_s19 = smov %s3623_s20 }
 0x8b7   : > { %s4308_s20 = smov %s3737_s7  ;;  %s4309_s21 = smov %s3631_s22 }
 0x8b8   : > { %s4310_s22 = smov %s4312_s26  ;;  %27 = sbr.rel (!%p25_p4) target bundleno = 12 (0xc), region = 136 }
 0x8bf   :  { %2483 = vsyncpa [#allocation3], 1 }
 0x8c0   :  { %2485 = vsyncpa [#allocation3 + $0x1], 1 }
 0x8c1   :  { %2486 = vsyncpa [#allocation6], 1 }
 0x8c2   :  { %2488 = vsyncpa [#allocation6 + $0x1], 1 }
 0x8c3   :  { %2489 = vsyncpa [#allocation4], 1 }
 0x8c4   :  { %2491 = vsyncpa [#allocation4 + $0x1], 1 }
 0x8c5   :  { %2492 = vsyncpa [#allocation9], 1 }
 0x8c6   :  { %2494 = vsyncpa [#allocation9 + $0x1], 1 }

</bundles_post_ra>
